<compile_context>
chip_gen: v6e
topology: v6e:2x2x1
jax: 0.10.0
libtpu: 0.0.40
codegen_flags: <defaults>
</compile_context>

<pallas_src>
import functools
from math import sqrt

import numpy as np
import jax
import jax.numpy as jnp
from jax import lax
from jax.experimental import pallas as pl
from jax.experimental.pallas import tpu as pltpu


def _split_softmax(sv, sn):
    """Row softmax over the (virtual) concatenation [sv | sn] without materializing it."""
    m = jnp.maximum(jnp.max(sv, axis=-1, keepdims=True),
                    jnp.max(sn, axis=-1, keepdims=True))
    ev = jnp.exp(sv - m)
    en = jnp.exp(sn - m)
    inv = pl.reciprocal(jnp.sum(ev, axis=-1, keepdims=True)
                        + jnp.sum(en, axis=-1, keepdims=True), approx=True)
    return ev * inv, en * inv


def _attend(q_query, keys_val, keys_none, vals_val, vals_none,
            r_stack, m_stack, a_mean, *, num_heads, d_k):
    """One co-attention direction for one batch element.

    q_query   : (S, dim)   f32   query rows (only the rows the caller keeps)
    keys_val  : (Sk, dim)  bf16  keys from this batch element's value rows
    keys_none : (nn, dim)  bf16  keys from the (batch-invariant) none rows
    vals_val  : (Sk, D)    bf16  values from this batch element's value rows
    vals_none : (nn, D)    bf16  values from the none rows
    r_stack   : (H*S, S)   bf16  head-stack row-replication matrix
    m_stack   : (H*S, dim) f32   head-stack column mask (1 inside head h's d_k block)
    a_mean    : (S, H*S)   bf16  head-mean matrix (r_stack.T / num_heads)
    returns (S, D) f32
    """
    dn_t = (((1,), (1,)), ((), ()))   # contract last dims of both operands (A @ B^T)

    if d_k % 128 == 0:
        # Lane-aligned heads (production dims): per-head static lane slices, so each
        # score matmul contracts only over d_k (no redundant MXU depth, no mask VPU ops).
        pv_sum = pn_sum = None
        for h in range(num_heads):
            sl = slice(h * d_k, (h + 1) * d_k)
            qh = q_query[:, sl].astype(jnp.bfloat16)
            sv = lax.dot_general(qh, keys_val[:, sl], dn_t,
                                 preferred_element_type=jnp.float32)
            sn = lax.dot_general(qh, keys_none[:, sl], dn_t,
                                 preferred_element_type=jnp.float32)
            pv, pn = _split_softmax(sv, sn)
            pv_sum = pv if pv_sum is None else pv_sum + pv
            pn_sum = pn if pn_sum is None else pn_sum + pn
        inv_h = 1.0 / num_heads
        pmv = (pv_sum * inv_h).astype(jnp.bfloat16)     # (S, Sk)
        pmn = (pn_sum * inv_h).astype(jnp.bfloat16)     # (S, nn)
    else:
        # Small d_k: stack all heads along sublanes.  r_stack replicates the S query
        # rows num_heads times, m_stack zeroes the other heads' columns, so ONE
        # full-width score matmul + ONE row softmax covers every head; the head mean is
        # another tiny matmul (a_mean).  Mask multiply / softmax / scaling stay in f32;
        # bf16 only at MXU operand boundaries.
        q_b = q_query.astype(jnp.bfloat16)
        stacked = (jnp.dot(r_stack, q_b, preferred_element_type=jnp.float32)
                   * m_stack).astype(jnp.bfloat16)                       # (H*S, dim)
        sv = lax.dot_general(stacked, keys_val, dn_t,
                             preferred_element_type=jnp.float32)         # (H*S, Sk)
        sn = lax.dot_general(stacked, keys_none, dn_t,
                             preferred_element_type=jnp.float32)         # (H*S, nn)
        pv, pn = _split_softmax(sv, sn)
        pmv = jnp.dot(a_mean, pv.astype(jnp.bfloat16),
                      preferred_element_type=jnp.float32).astype(jnp.bfloat16)
        pmn = jnp.dot(a_mean, pn.astype(jnp.bfloat16),
                      preferred_element_type=jnp.float32).astype(jnp.bfloat16)

    # value is broadcast over heads, so mean_h(p_h @ V) == (mean_h p_h) @ V; the AV
    # matmul is split over [value rows ; none rows] (no in-kernel concatenation).
    return (jnp.dot(pmv, vals_val, preferred_element_type=jnp.float32)
            + jnp.dot(pmn, vals_none, preferred_element_type=jnp.float32))


def dense_coattn_kernel(v1_ref, v2_ref, w1_ref, w2_ref, qn1_ref, qn2_ref,
                        n1_ref, n2_ref, r1_ref, m1_ref, a1_ref,
                        r2_ref, m2_ref, a2_ref, o1_ref, o2_ref, *,
                        num_heads, batch_block, seq1, seq2):
    Bb, S1, S2 = batch_block, seq1, seq2
    dim = w1_ref.shape[1]
    d_k = dim // num_heads

    # One bf16 cast per input block; MXU operands are bf16 with f32 accumulation.
    v1_b = v1_ref[...].astype(jnp.bfloat16)     # (Bb*S1, D1)
    v2_b = v2_ref[...].astype(jnp.bfloat16)     # (Bb*S2, D2)

    # Projections with the whole batch block flattened into the MXU M dimension
    # (a single matmul per direction per grid step).  w1 already carries 1/sqrt(d_k).
    q1 = jnp.dot(v1_b, w1_ref[...], preferred_element_type=jnp.float32)   # (Bb*S1, dim)
    q2 = jnp.dot(v2_b, w2_ref[...], preferred_element_type=jnp.float32)   # (Bb*S2, dim)

    qn1 = qn1_ref[...]           # (nn, dim) bf16, scaled none keys (direction 1)
    qn2 = qn2_ref[...]           # (nn, dim) bf16, none keys (direction 2)
    n1 = n1_ref[...]             # (nn, D1) bf16, none values (direction 1)
    n2 = n2_ref[...]             # (nn, D2) bf16, none values (direction 2)
    r1, m1, a1 = r1_ref[...], m1_ref[...], a1_ref[...]
    r2, m2, a2 = r2_ref[...], m2_ref[...], a2_ref[...]

    # Static unroll over the batch block (Bb is capped small by the wrapper).
    # TODO(synk): switch to a fori_loop + q scratch refs if Bb needs to grow further.
    for b in range(Bb):
        q1b = q1[b * S1:(b + 1) * S1, :]         # (S1, dim) f32  (carries the scale)
        q2b = q2[b * S2:(b + 1) * S2, :]         # (S2, dim) f32
        q1b_b = q1b.astype(jnp.bfloat16)
        q2b_b = q2b.astype(jnp.bfloat16)
        v1bb = v1_b[b * S1:(b + 1) * S1, :]      # (S1, D1) bf16
        v2bb = v2_b[b * S2:(b + 1) * S2, :]      # (S2, D2) bf16

        # Direction 1: queries from value2 rows, keys/values from the value1 side.
        # Key/value ordering is values-first, nones-last: softmax-weighted sums are
        # permutation-invariant over keys, so this matches the reference's nones-first
        # concat, and the query slice [:S] matches the reference's [num_none:] slice.
        out1 = _attend(q2b, q1b_b, qn1, v1bb, n1, r2, m2, a2,
                       num_heads=num_heads, d_k=d_k)
        o1_ref[b * S2:(b + 1) * S2, :] = out1.astype(o1_ref.dtype)

        # Direction 2: queries from value1 rows (these carry 1/sqrt(d_k)),
        # keys/values from the value2 side.
        out2 = _attend(q1b, q2b_b, qn2, v2bb, n2, r1, m1, a1,
                       num_heads=num_heads, d_k=d_k)
        o2_ref[b * S1:(b + 1) * S1, :] = out2.astype(o2_ref.dtype)


def _choose_batch_block(batch, seq1, seq2, bytes_per_batch,
                        max_block=8, vmem_budget=8 << 20):
    """Largest batch block that divides `batch`, keeps the blocked row dims either a
    multiple of 8 sublanes or the full array (BlockSpec legality), and stays well under
    the scoped-VMEM default (32 MiB on v7x; every blocked operand is double-buffered)."""
    best = None
    for bb in range(1, min(batch, max_block) + 1):
        if batch % bb:
            continue
        aligned = (bb * seq1) % 8 == 0 and (bb * seq2) % 8 == 0
        if not (aligned or bb == batch):
            continue
        if best is not None and 3 * bb * bytes_per_batch > vmem_budget:
            continue
        best = bb
    if best is None:
        # No aligned block <= max_block divides the batch: fall back to one
        # full-array step (always shape-legal).
        # TODO(synk): pad the batch instead if batch*seq*dim outgrows VMEM here.
        best = batch
    return best


def _head_stack_constants(seq, num_heads, dim, d_k):
    """Constant matrices for sublane head-stacking (built host-side, baked into the
    program): R replicates the seq query rows once per head, M keeps only head h's d_k
    columns in row block h, A = R.T / num_heads averages the stacked rows back."""
    eye = np.eye(seq, dtype=np.float32)
    r = np.tile(eye, (num_heads, 1))                                   # (H*S, S)
    head_of_row = np.repeat(np.arange(num_heads), seq)[:, None]        # (H*S, 1)
    col_head = np.arange(dim)[None, :] // d_k                          # (1, dim)
    m = (col_head == head_of_row).astype(np.float32)                   # (H*S, dim)
    a = r.T / float(num_heads)                                         # (S, H*S)
    return (jnp.asarray(r, dtype=jnp.bfloat16),
            jnp.asarray(m, dtype=jnp.float32),
            jnp.asarray(a, dtype=jnp.bfloat16))


def dense_coattn(value1, value2, w1, w2, none1, none2, *,
                 num_heads, max_batch_block=8):
    """Forward pass of DenseCoAttn (is_multi_head=False, no masks, eval-mode dropout)."""
    B, S1, D1 = value1.shape
    _, S2, D2 = value2.shape
    nn = none1.shape[0]
    dim = w1.shape[1]
    assert dim % num_heads == 0
    d_k = dim // num_heads

    # Fold 1/sqrt(d_k) into the value1-side projection: q1 appears exactly once in both
    # score products (keys of direction 1, queries of direction 2).
    w1s = w1.astype(jnp.float32) * (1.0 / sqrt(d_k))
    w1_b = w1s.astype(jnp.bfloat16)
    w2_b = w2.astype(jnp.bfloat16)

    # The none rows are batch-invariant: project them to keys once here (tiny) instead
    # of materializing (B, nn, D) copies; pass their values as bf16 for the AV matmul.
    qn1 = jnp.dot(none1.astype(jnp.float32), w1s).astype(jnp.bfloat16)     # (nn, dim)
    qn2 = jnp.dot(none2.astype(jnp.float32),
                  w2.astype(jnp.float32)).astype(jnp.bfloat16)             # (nn, dim)
    n1_b = none1.astype(jnp.bfloat16)
    n2_b = none2.astype(jnp.bfloat16)

    r1, m1, a1 = _head_stack_constants(S1, num_heads, dim, d_k)
    r2, m2, a2 = _head_stack_constants(S2, num_heads, dim, d_k)

    # Flatten batch into the row (M / sublane) dimension — contiguous, free reshape.
    v1_2d = value1.reshape(B * S1, D1)
    v2_2d = value2.reshape(B * S2, D2)

    bytes_per_batch = 4 * (S1 * D1 + S2 * D2 + S2 * D1 + S1 * D2 + (S1 + S2) * dim)
    Bb = _choose_batch_block(B, S1, S2, bytes_per_batch, max_block=max_batch_block)
    grid = (B // Bb,)

    kernel = functools.partial(dense_coattn_kernel, num_heads=num_heads,
                               batch_block=Bb, seq1=S1, seq2=S2)

    blk = lambda i: (i, 0)      # batch-blocked operands
    rep = lambda i: (0, 0)      # step-invariant operands (weights / nones / constants)

    o1, o2 = pl.pallas_call(
        kernel,
        out_shape=(jax.ShapeDtypeStruct((B * S2, D1), value1.dtype),
                   jax.ShapeDtypeStruct((B * S1, D2), value2.dtype)),
        grid=grid,
        in_specs=[
            pl.BlockSpec((Bb * S1, D1), blk),
            pl.BlockSpec((Bb * S2, D2), blk),
            pl.BlockSpec((D1, dim), rep),
            pl.BlockSpec((D2, dim), rep),
            pl.BlockSpec((nn, dim), rep),
            pl.BlockSpec((nn, dim), rep),
            pl.BlockSpec((nn, D1), rep),
            pl.BlockSpec((nn, D2), rep),
            pl.BlockSpec((num_heads * S1, S1), rep),
            pl.BlockSpec((num_heads * S1, dim), rep),
            pl.BlockSpec((S1, num_heads * S1), rep),
            pl.BlockSpec((num_heads * S2, S2), rep),
            pl.BlockSpec((num_heads * S2, dim), rep),
            pl.BlockSpec((S2, num_heads * S2), rep),
        ],
        out_specs=(
            pl.BlockSpec((Bb * S2, D1), blk),
            pl.BlockSpec((Bb * S1, D2), blk),
        ),
        # "parallel" fills both v7x TensorCores when the grid is >= 2; it is a no-op on
        # single-core v5e/v6e (the batch blocking is what amortizes the serial loop).
        compiler_params=pltpu.CompilerParams(dimension_semantics=("parallel",)),
    )(v1_2d, v2_2d, w1_b, w2_b, qn1, qn2, n1_b, n2_b,
      r1, m1, a1, r2, m2, a2)

    return o1.reshape(B, S2, D1), o2.reshape(B, S1, D2)


def dense_coattn_reference(value1, value2, w1, w2, none1, none2, *, num_heads):
    """Pure-JAX, full-f32, highest-precision replica of the PyTorch forward."""
    hi = jax.lax.Precision.HIGHEST
    B, S1, D1 = value1.shape
    _, S2, D2 = value2.shape
    nn = none1.shape[0]
    dim = w1.shape[1]
    d_k = dim // num_heads
    v1c = jnp.concatenate([jnp.broadcast_to(none1[None], (B, nn, D1)), value1], 1)
    v2c = jnp.concatenate([jnp.broadcast_to(none2[None], (B, nn, D2)), value2], 1)
    q1 = jnp.matmul(v1c, w1, precision=hi).reshape(B, -1, num_heads, d_k).transpose(0, 2, 1, 3)
    q2 = jnp.matmul(v2c, w2, precision=hi).reshape(B, -1, num_heads, d_k).transpose(0, 2, 1, 3)

    def attn(q, k, v):
        s = jnp.einsum('bhqd,bhkd->bhqk', q, k, precision=hi) / sqrt(d_k)
        p = jax.nn.softmax(s, axis=-1)
        return jnp.einsum('bhqk,bkd->bhqd', p, v, precision=hi)

    w1_out = attn(q2, q1, v1c).mean(axis=1)[:, nn:, :]
    w2_out = attn(q1, q2, v2c).mean(axis=1)[:, nn:, :]
    return w1_out, w2_out


if __name__ == "__main__":
    B, S1, S2 = 2, 8, 10
    D1, D2 = 32, 32              # dim1, dim2
    num_heads, num_none = 4, 3
    dim = min(D1, D2)            # d_k = 8

    key = jax.random.PRNGKey(0)
    k1, k2, k3, k4, k5, k6 = jax.random.split(key, 6)

    value1 = jax.random.normal(k1, (B, S1, D1), jnp.float32)
    value2 = jax.random.normal(k2, (B, S2, D2), jnp.float32)

    # Linear(dim1, dim, bias=False) weights, stored transposed (in, out); PyTorch
    # default init is U(-1/sqrt(fan_in), 1/sqrt(fan_in)).
    lim1 = 1.0 / sqrt(D1)
    w1 = jax.random.uniform(k3, (D1, dim), jnp.float32, -lim1, lim1)
    lim2 = 1.0 / sqrt(D2)
    w2 = jax.random.uniform(k4, (D2, dim), jnp.float32, -lim2, lim2)

    # nones: xavier_uniform on (num_none, dim*)
    b1 = sqrt(6.0 / (num_none + D1))
    none1 = jax.random.uniform(k5, (num_none, D1), jnp.float32, -b1, b1)
    b2 = sqrt(6.0 / (num_none + D2))
    none2 = jax.random.uniform(k6, (num_none, D2), jnp.float32, -b2, b2)

    fwd = jax.jit(functools.partial(dense_coattn, num_heads=num_heads))
    out1, out2 = fwd(value1, value2, w1, w2, none1, none2)
    jax.block_until_ready((out1, out2))

    ref1, ref2 = dense_coattn_reference(value1, value2, w1, w2, none1, none2,
                                        num_heads=num_heads)
    assert out1.shape == (B, S2, D1) and out2.shape == (B, S1, D2)
    # bf16 MXU operands + bf16 probabilities + approx softmax reciprocal vs a full-f32
    # highest-precision reference -> tolerance loosened accordingly (~1e-3..1e-2 errors;
    # error grows mildly with the number of keys).
    assert jnp.allclose(out1, ref1, atol=2e-2, rtol=2e-2)
    assert jnp.allclose(out2, ref2, atol=2e-2, rtol=2e-2)

    print("KERNEL_OK")
</pallas_src>

<mosaic_0001>
module attributes {stable_mosaic.version = 11 : i64} {
  func.func @dense_coattn_kernel(%arg0: i32, %arg1: memref<16x32xf32, #tpu.memory_space<vmem>>, %arg2: memref<20x32xf32, #tpu.memory_space<vmem>>, %arg3: memref<32x32xbf16, #tpu.memory_space<vmem>>, %arg4: memref<32x32xbf16, #tpu.memory_space<vmem>>, %arg5: memref<3x32xbf16, #tpu.memory_space<vmem>>, %arg6: memref<3x32xbf16, #tpu.memory_space<vmem>>, %arg7: memref<3x32xbf16, #tpu.memory_space<vmem>>, %arg8: memref<3x32xbf16, #tpu.memory_space<vmem>>, %arg9: memref<32x8xbf16, #tpu.memory_space<vmem>>, %arg10: memref<32x32xf32, #tpu.memory_space<vmem>>, %arg11: memref<8x32xbf16, #tpu.memory_space<vmem>>, %arg12: memref<40x10xbf16, #tpu.memory_space<vmem>>, %arg13: memref<40x32xf32, #tpu.memory_space<vmem>>, %arg14: memref<10x40xbf16, #tpu.memory_space<vmem>>, %arg15: memref<20x32xf32, #tpu.memory_space<vmem>>, %arg16: memref<16x32xf32, #tpu.memory_space<vmem>>) attributes {dimension_semantics = [#tpu.dimension_semantics<parallel>], iteration_bounds = array<i64: 1>, scalar_prefetch = 0 : i64, scratch_operands = 0 : i64, tpu.core_type = #tpu.core_type<tc>, window_params = [{transform_indices = @transform_0, window_bounds = array<i64: 16, 32>}, {transform_indices = @transform_1, window_bounds = array<i64: 20, 32>}, {pipeline_mode = #tpu.pipeline_mode<synchronous>, transform_indices = @transform_2, window_bounds = array<i64: 32, 32>}, {pipeline_mode = #tpu.pipeline_mode<synchronous>, transform_indices = @transform_3, window_bounds = array<i64: 32, 32>}, {pipeline_mode = #tpu.pipeline_mode<synchronous>, transform_indices = @transform_4, window_bounds = array<i64: 3, 32>}, {pipeline_mode = #tpu.pipeline_mode<synchronous>, transform_indices = @transform_5, window_bounds = array<i64: 3, 32>}, {pipeline_mode = #tpu.pipeline_mode<synchronous>, transform_indices = @transform_6, window_bounds = array<i64: 3, 32>}, {pipeline_mode = #tpu.pipeline_mode<synchronous>, transform_indices = @transform_7, window_bounds = array<i64: 3, 32>}, {pipeline_mode = #tpu.pipeline_mode<synchronous>, transform_indices = @transform_8, window_bounds = array<i64: 32, 8>}, {pipeline_mode = #tpu.pipeline_mode<synchronous>, transform_indices = @transform_9, window_bounds = array<i64: 32, 32>}, {pipeline_mode = #tpu.pipeline_mode<synchronous>, transform_indices = @transform_10, window_bounds = array<i64: 8, 32>}, {pipeline_mode = #tpu.pipeline_mode<synchronous>, transform_indices = @transform_11, window_bounds = array<i64: 40, 10>}, {pipeline_mode = #tpu.pipeline_mode<synchronous>, transform_indices = @transform_12, window_bounds = array<i64: 40, 32>}, {pipeline_mode = #tpu.pipeline_mode<synchronous>, transform_indices = @transform_13, window_bounds = array<i64: 10, 40>}, {transform_indices = @transform_14, window_bounds = array<i64: 20, 32>}, {transform_indices = @transform_15, window_bounds = array<i64: 16, 32>}]} {
    %c0 = arith.constant 0 : index
    %c0_0 = arith.constant 0 : index
    %0 = vector.load %arg1[%c0, %c0_0] : memref<16x32xf32, #tpu.memory_space<vmem>>, vector<16x32xf32>
    %1 = arith.truncf %0 : vector<16x32xf32> to vector<16x32xbf16>
    %c0_1 = arith.constant 0 : index
    %c0_2 = arith.constant 0 : index
    %2 = vector.load %arg2[%c0_1, %c0_2] : memref<20x32xf32, #tpu.memory_space<vmem>>, vector<20x32xf32>
    %3 = arith.truncf %2 : vector<20x32xf32> to vector<20x32xbf16>
    %c0_3 = arith.constant 0 : index
    %c0_4 = arith.constant 0 : index
    %4 = vector.load %arg3[%c0_3, %c0_4] : memref<32x32xbf16, #tpu.memory_space<vmem>>, vector<32x32xbf16>
    %cst = arith.constant dense<0.000000e+00> : vector<16x32xf32>
    %5 = tpu.matmul %1, %4, %cst {dimension_numbers = #tpu.dot_dimension_numbers<[1], [0], [0], [1], [0, 0, 1, 1], [], []>} : vector<16x32xbf16>, vector<32x32xbf16>, vector<16x32xf32> -> vector<16x32xf32>
    %c0_5 = arith.constant 0 : index
    %c0_6 = arith.constant 0 : index
    %6 = vector.load %arg4[%c0_5, %c0_6] : memref<32x32xbf16, #tpu.memory_space<vmem>>, vector<32x32xbf16>
    %cst_7 = arith.constant dense<0.000000e+00> : vector<20x32xf32>
    %7 = tpu.matmul %3, %6, %cst_7 {dimension_numbers = #tpu.dot_dimension_numbers<[1], [0], [0], [1], [0, 0, 1, 1], [], []>} : vector<20x32xbf16>, vector<32x32xbf16>, vector<20x32xf32> -> vector<20x32xf32>
    %c0_8 = arith.constant 0 : index
    %c0_9 = arith.constant 0 : index
    %8 = vector.load %arg5[%c0_8, %c0_9] : memref<3x32xbf16, #tpu.memory_space<vmem>>, vector<3x32xbf16>
    %c0_10 = arith.constant 0 : index
    %c0_11 = arith.constant 0 : index
    %9 = vector.load %arg6[%c0_10, %c0_11] : memref<3x32xbf16, #tpu.memory_space<vmem>>, vector<3x32xbf16>
    %c0_12 = arith.constant 0 : index
    %c0_13 = arith.constant 0 : index
    %10 = vector.load %arg7[%c0_12, %c0_13] : memref<3x32xbf16, #tpu.memory_space<vmem>>, vector<3x32xbf16>
    %c0_14 = arith.constant 0 : index
    %c0_15 = arith.constant 0 : index
    %11 = vector.load %arg8[%c0_14, %c0_15] : memref<3x32xbf16, #tpu.memory_space<vmem>>, vector<3x32xbf16>
    %c0_16 = arith.constant 0 : index
    %c0_17 = arith.constant 0 : index
    %12 = vector.load %arg9[%c0_16, %c0_17] : memref<32x8xbf16, #tpu.memory_space<vmem>>, vector<32x8xbf16>
    %c0_18 = arith.constant 0 : index
    %c0_19 = arith.constant 0 : index
    %13 = vector.load %arg10[%c0_18, %c0_19] : memref<32x32xf32, #tpu.memory_space<vmem>>, vector<32x32xf32>
    %c0_20 = arith.constant 0 : index
    %c0_21 = arith.constant 0 : index
    %14 = vector.load %arg11[%c0_20, %c0_21] : memref<8x32xbf16, #tpu.memory_space<vmem>>, vector<8x32xbf16>
    %c0_22 = arith.constant 0 : index
    %c0_23 = arith.constant 0 : index
    %15 = vector.load %arg12[%c0_22, %c0_23] : memref<40x10xbf16, #tpu.memory_space<vmem>>, vector<40x10xbf16>
    %c0_24 = arith.constant 0 : index
    %c0_25 = arith.constant 0 : index
    %16 = vector.load %arg13[%c0_24, %c0_25] : memref<40x32xf32, #tpu.memory_space<vmem>>, vector<40x32xf32>
    %c0_26 = arith.constant 0 : index
    %c0_27 = arith.constant 0 : index
    %17 = vector.load %arg14[%c0_26, %c0_27] : memref<10x40xbf16, #tpu.memory_space<vmem>>, vector<10x40xbf16>
    %18 = vector.extract_strided_slice %5 {offsets = [0, 0], sizes = [8, 32], strides = [1, 1]} : vector<16x32xf32> to vector<8x32xf32>
    %19 = vector.extract_strided_slice %7 {offsets = [0, 0], sizes = [10, 32], strides = [1, 1]} : vector<20x32xf32> to vector<10x32xf32>
    %20 = arith.truncf %18 : vector<8x32xf32> to vector<8x32xbf16>
    %21 = arith.truncf %19 : vector<10x32xf32> to vector<10x32xbf16>
    %22 = vector.extract_strided_slice %1 {offsets = [0, 0], sizes = [8, 32], strides = [1, 1]} : vector<16x32xbf16> to vector<8x32xbf16>
    %23 = vector.extract_strided_slice %3 {offsets = [0, 0], sizes = [10, 32], strides = [1, 1]} : vector<20x32xbf16> to vector<10x32xbf16>
    %24 = arith.truncf %19 : vector<10x32xf32> to vector<10x32xbf16>
    %cst_28 = arith.constant dense<0.000000e+00> : vector<40x32xf32>
    %25 = tpu.matmul %15, %24, %cst_28 {dimension_numbers = #tpu.dot_dimension_numbers<[1], [0], [0], [1], [0, 0, 1, 1], [], []>} : vector<40x10xbf16>, vector<10x32xbf16>, vector<40x32xf32> -> vector<40x32xf32>
    %26 = arith.mulf %25, %16 : vector<40x32xf32>
    %27 = arith.truncf %26 : vector<40x32xf32> to vector<40x32xbf16>
    %cst_29 = arith.constant dense<0.000000e+00> : vector<40x8xf32>
    %28 = tpu.matmul %27, %20, %cst_29 {dimension_numbers = #tpu.dot_dimension_numbers<[1], [1], [0], [0], [0, 0, 1, 0], [], []>} : vector<40x32xbf16>, vector<8x32xbf16>, vector<40x8xf32> -> vector<40x8xf32>
    %cst_30 = arith.constant dense<0.000000e+00> : vector<40x3xf32>
    %29 = tpu.matmul %27, %8, %cst_30 {dimension_numbers = #tpu.dot_dimension_numbers<[1], [1], [0], [0], [0, 0, 1, 0], [], []>} : vector<40x32xbf16>, vector<3x32xbf16>, vector<40x3xf32> -> vector<40x3xf32>
    %cst_31 = arith.constant dense<0xFF800000> : vector<40xf32>
    %30 = vector.multi_reduction <maximumf>, %28, %cst_31 [1] : vector<40x8xf32> to vector<40xf32>
    %31 = vector.shape_cast %30 : vector<40xf32> to vector<40x1xf32>
    %cst_32 = arith.constant dense<0xFF800000> : vector<40xf32>
    %32 = vector.multi_reduction <maximumf>, %29, %cst_32 [1] : vector<40x3xf32> to vector<40xf32>
    %33 = vector.shape_cast %32 : vector<40xf32> to vector<40x1xf32>
    %34 = arith.maximumf %31, %33 : vector<40x1xf32>
    %35 = vector.broadcast %34 : vector<40x1xf32> to vector<40x8xf32>
    %36 = arith.subf %28, %35 : vector<40x8xf32>
    %37 = math.exp %36 : vector<40x8xf32>
    %38 = vector.broadcast %34 : vector<40x1xf32> to vector<40x3xf32>
    %39 = arith.subf %29, %38 : vector<40x3xf32>
    %40 = math.exp %39 : vector<40x3xf32>
    %cst_33 = arith.constant dense<0.000000e+00> : vector<40xf32>
    %41 = vector.multi_reduction <add>, %37, %cst_33 [1] : vector<40x8xf32> to vector<40xf32>
    %42 = vector.shape_cast %41 : vector<40xf32> to vector<40x1xf32>
    %cst_34 = arith.constant dense<0.000000e+00> : vector<40xf32>
    %43 = vector.multi_reduction <add>, %40, %cst_34 [1] : vector<40x3xf32> to vector<40xf32>
    %44 = vector.shape_cast %43 : vector<40xf32> to vector<40x1xf32>
    %45 = arith.addf %42, %44 : vector<40x1xf32>
    %46 = tpu.reciprocal %45 {approx = true} : vector<40x1xf32> -> vector<40x1xf32>
    %47 = vector.broadcast %46 : vector<40x1xf32> to vector<40x8xf32>
    %48 = arith.mulf %37, %47 : vector<40x8xf32>
    %49 = vector.broadcast %46 : vector<40x1xf32> to vector<40x3xf32>
    %50 = arith.mulf %40, %49 : vector<40x3xf32>
    %51 = arith.truncf %48 : vector<40x8xf32> to vector<40x8xbf16>
    %cst_35 = arith.constant dense<0.000000e+00> : vector<10x8xf32>
    %52 = tpu.matmul %17, %51, %cst_35 {dimension_numbers = #tpu.dot_dimension_numbers<[1], [0], [0], [1], [0, 0, 1, 1], [], []>} : vector<10x40xbf16>, vector<40x8xbf16>, vector<10x8xf32> -> vector<10x8xf32>
    %53 = arith.truncf %52 : vector<10x8xf32> to vector<10x8xbf16>
    %54 = arith.truncf %50 : vector<40x3xf32> to vector<40x3xbf16>
    %cst_36 = arith.constant dense<0.000000e+00> : vector<10x3xf32>
    %55 = tpu.matmul %17, %54, %cst_36 {dimension_numbers = #tpu.dot_dimension_numbers<[1], [0], [0], [1], [0, 0, 1, 1], [], []>} : vector<10x40xbf16>, vector<40x3xbf16>, vector<10x3xf32> -> vector<10x3xf32>
    %56 = arith.truncf %55 : vector<10x3xf32> to vector<10x3xbf16>
    %cst_37 = arith.constant dense<0.000000e+00> : vector<10x32xf32>
    %57 = tpu.matmul %53, %22, %cst_37 {dimension_numbers = #tpu.dot_dimension_numbers<[1], [0], [0], [1], [0, 0, 1, 1], [], []>} : vector<10x8xbf16>, vector<8x32xbf16>, vector<10x32xf32> -> vector<10x32xf32>
    %cst_38 = arith.constant dense<0.000000e+00> : vector<10x32xf32>
    %58 = tpu.matmul %56, %10, %cst_38 {dimension_numbers = #tpu.dot_dimension_numbers<[1], [0], [0], [1], [0, 0, 1, 1], [], []>} : vector<10x3xbf16>, vector<3x32xbf16>, vector<10x32xf32> -> vector<10x32xf32>
    %59 = arith.addf %57, %58 : vector<10x32xf32>
    %c0_39 = arith.constant 0 : index
    %c0_40 = arith.constant 0 : index
    %60 = vector.load %arg15[%c0_39, %c0_40] : memref<20x32xf32, #tpu.memory_space<vmem>>, vector<10x32xf32>
    tpu.vector_store %arg15[%c0_39, %c0_40], %59 {strides = array<i32>} : memref<20x32xf32, #tpu.memory_space<vmem>>, vector<10x32xf32>,
    %61 = arith.truncf %18 : vector<8x32xf32> to vector<8x32xbf16>
    %cst_41 = arith.constant dense<0.000000e+00> : vector<32x32xf32>
    %62 = tpu.matmul %12, %61, %cst_41 {dimension_numbers = #tpu.dot_dimension_numbers<[1], [0], [0], [1], [0, 0, 1, 1], [], []>} : vector<32x8xbf16>, vector<8x32xbf16>, vector<32x32xf32> -> vector<32x32xf32>
    %63 = arith.mulf %62, %13 : vector<32x32xf32>
    %64 = arith.truncf %63 : vector<32x32xf32> to vector<32x32xbf16>
    %cst_42 = arith.constant dense<0.000000e+00> : vector<32x10xf32>
    %65 = tpu.matmul %64, %21, %cst_42 {dimension_numbers = #tpu.dot_dimension_numbers<[1], [1], [0], [0], [0, 0, 1, 0], [], []>} : vector<32x32xbf16>, vector<10x32xbf16>, vector<32x10xf32> -> vector<32x10xf32>
    %cst_43 = arith.constant dense<0.000000e+00> : vector<32x3xf32>
    %66 = tpu.matmul %64, %9, %cst_43 {dimension_numbers = #tpu.dot_dimension_numbers<[1], [1], [0], [0], [0, 0, 1, 0], [], []>} : vector<32x32xbf16>, vector<3x32xbf16>, vector<32x3xf32> -> vector<32x3xf32>
    %cst_44 = arith.constant dense<0xFF800000> : vector<32xf32>
    %67 = vector.multi_reduction <maximumf>, %65, %cst_44 [1] : vector<32x10xf32> to vector<32xf32>
    %68 = vector.shape_cast %67 : vector<32xf32> to vector<32x1xf32>
    %cst_45 = arith.constant dense<0xFF800000> : vector<32xf32>
    %69 = vector.multi_reduction <maximumf>, %66, %cst_45 [1] : vector<32x3xf32> to vector<32xf32>
    %70 = vector.shape_cast %69 : vector<32xf32> to vector<32x1xf32>
    %71 = arith.maximumf %68, %70 : vector<32x1xf32>
    %72 = vector.broadcast %71 : vector<32x1xf32> to vector<32x10xf32>
    %73 = arith.subf %65, %72 : vector<32x10xf32>
    %74 = math.exp %73 : vector<32x10xf32>
    %75 = vector.broadcast %71 : vector<32x1xf32> to vector<32x3xf32>
    %76 = arith.subf %66, %75 : vector<32x3xf32>
    %77 = math.exp %76 : vector<32x3xf32>
    %cst_46 = arith.constant dense<0.000000e+00> : vector<32xf32>
    %78 = vector.multi_reduction <add>, %74, %cst_46 [1] : vector<32x10xf32> to vector<32xf32>
    %79 = vector.shape_cast %78 : vector<32xf32> to vector<32x1xf32>
    %cst_47 = arith.constant dense<0.000000e+00> : vector<32xf32>
    %80 = vector.multi_reduction <add>, %77, %cst_47 [1] : vector<32x3xf32> to vector<32xf32>
    %81 = vector.shape_cast %80 : vector<32xf32> to vector<32x1xf32>
    %82 = arith.addf %79, %81 : vector<32x1xf32>
    %83 = tpu.reciprocal %82 {approx = true} : vector<32x1xf32> -> vector<32x1xf32>
    %84 = vector.broadcast %83 : vector<32x1xf32> to vector<32x10xf32>
    %85 = arith.mulf %74, %84 : vector<32x10xf32>
    %86 = vector.broadcast %83 : vector<32x1xf32> to vector<32x3xf32>
    %87 = arith.mulf %77, %86 : vector<32x3xf32>
    %88 = arith.truncf %85 : vector<32x10xf32> to vector<32x10xbf16>
    %cst_48 = arith.constant dense<0.000000e+00> : vector<8x10xf32>
    %89 = tpu.matmul %14, %88, %cst_48 {dimension_numbers = #tpu.dot_dimension_numbers<[1], [0], [0], [1], [0, 0, 1, 1], [], []>} : vector<8x32xbf16>, vector<32x10xbf16>, vector<8x10xf32> -> vector<8x10xf32>
    %90 = arith.truncf %89 : vector<8x10xf32> to vector<8x10xbf16>
    %91 = arith.truncf %87 : vector<32x3xf32> to vector<32x3xbf16>
    %cst_49 = arith.constant dense<0.000000e+00> : vector<8x3xf32>
    %92 = tpu.matmul %14, %91, %cst_49 {dimension_numbers = #tpu.dot_dimension_numbers<[1], [0], [0], [1], [0, 0, 1, 1], [], []>} : vector<8x32xbf16>, vector<32x3xbf16>, vector<8x3xf32> -> vector<8x3xf32>
    %93 = arith.truncf %92 : vector<8x3xf32> to vector<8x3xbf16>
    %cst_50 = arith.constant dense<0.000000e+00> : vector<8x32xf32>
    %94 = tpu.matmul %90, %23, %cst_50 {dimension_numbers = #tpu.dot_dimension_numbers<[1], [0], [0], [1], [0, 0, 1, 1], [], []>} : vector<8x10xbf16>, vector<10x32xbf16>, vector<8x32xf32> -> vector<8x32xf32>
    %cst_51 = arith.constant dense<0.000000e+00> : vector<8x32xf32>
    %95 = tpu.matmul %93, %11, %cst_51 {dimension_numbers = #tpu.dot_dimension_numbers<[1], [0], [0], [1], [0, 0, 1, 1], [], []>} : vector<8x3xbf16>, vector<3x32xbf16>, vector<8x32xf32> -> vector<8x32xf32>
    %96 = arith.addf %94, %95 : vector<8x32xf32>
    %c0_52 = arith.constant 0 : index
    %c0_53 = arith.constant 0 : index
    %97 = vector.load %arg16[%c0_52, %c0_53] : memref<16x32xf32, #tpu.memory_space<vmem>>, vector<8x32xf32>
    tpu.vector_store %arg16[%c0_52, %c0_53], %96 {strides = array<i32>} : memref<16x32xf32, #tpu.memory_space<vmem>>, vector<8x32xf32>,
    %98 = vector.extract_strided_slice %5 {offsets = [8, 0], sizes = [8, 32], strides = [1, 1]} : vector<16x32xf32> to vector<8x32xf32>
    %99 = vector.extract_strided_slice %7 {offsets = [10, 0], sizes = [10, 32], strides = [1, 1]} : vector<20x32xf32> to vector<10x32xf32>
    %100 = arith.truncf %98 : vector<8x32xf32> to vector<8x32xbf16>
    %101 = arith.truncf %99 : vector<10x32xf32> to vector<10x32xbf16>
    %102 = vector.extract_strided_slice %1 {offsets = [8, 0], sizes = [8, 32], strides = [1, 1]} : vector<16x32xbf16> to vector<8x32xbf16>
    %103 = vector.extract_strided_slice %3 {offsets = [10, 0], sizes = [10, 32], strides = [1, 1]} : vector<20x32xbf16> to vector<10x32xbf16>
    %104 = arith.truncf %99 : vector<10x32xf32> to vector<10x32xbf16>
    %cst_54 = arith.constant dense<0.000000e+00> : vector<40x32xf32>
    %105 = tpu.matmul %15, %104, %cst_54 {dimension_numbers = #tpu.dot_dimension_numbers<[1], [0], [0], [1], [0, 0, 1, 1], [], []>} : vector<40x10xbf16>, vector<10x32xbf16>, vector<40x32xf32> -> vector<40x32xf32>
    %106 = arith.mulf %105, %16 : vector<40x32xf32>
    %107 = arith.truncf %106 : vector<40x32xf32> to vector<40x32xbf16>
    %cst_55 = arith.constant dense<0.000000e+00> : vector<40x8xf32>
    %108 = tpu.matmul %107, %100, %cst_55 {dimension_numbers = #tpu.dot_dimension_numbers<[1], [1], [0], [0], [0, 0, 1, 0], [], []>} : vector<40x32xbf16>, vector<8x32xbf16>, vector<40x8xf32> -> vector<40x8xf32>
    %cst_56 = arith.constant dense<0.000000e+00> : vector<40x3xf32>
    %109 = tpu.matmul %107, %8, %cst_56 {dimension_numbers = #tpu.dot_dimension_numbers<[1], [1], [0], [0], [0, 0, 1, 0], [], []>} : vector<40x32xbf16>, vector<3x32xbf16>, vector<40x3xf32> -> vector<40x3xf32>
    %cst_57 = arith.constant dense<0xFF800000> : vector<40xf32>
    %110 = vector.multi_reduction <maximumf>, %108, %cst_57 [1] : vector<40x8xf32> to vector<40xf32>
    %111 = vector.shape_cast %110 : vector<40xf32> to vector<40x1xf32>
    %cst_58 = arith.constant dense<0xFF800000> : vector<40xf32>
    %112 = vector.multi_reduction <maximumf>, %109, %cst_58 [1] : vector<40x3xf32> to vector<40xf32>
    %113 = vector.shape_cast %112 : vector<40xf32> to vector<40x1xf32>
    %114 = arith.maximumf %111, %113 : vector<40x1xf32>
    %115 = vector.broadcast %114 : vector<40x1xf32> to vector<40x8xf32>
    %116 = arith.subf %108, %115 : vector<40x8xf32>
    %117 = math.exp %116 : vector<40x8xf32>
    %118 = vector.broadcast %114 : vector<40x1xf32> to vector<40x3xf32>
    %119 = arith.subf %109, %118 : vector<40x3xf32>
    %120 = math.exp %119 : vector<40x3xf32>
    %cst_59 = arith.constant dense<0.000000e+00> : vector<40xf32>
    %121 = vector.multi_reduction <add>, %117, %cst_59 [1] : vector<40x8xf32> to vector<40xf32>
    %122 = vector.shape_cast %121 : vector<40xf32> to vector<40x1xf32>
    %cst_60 = arith.constant dense<0.000000e+00> : vector<40xf32>
    %123 = vector.multi_reduction <add>, %120, %cst_60 [1] : vector<40x3xf32> to vector<40xf32>
    %124 = vector.shape_cast %123 : vector<40xf32> to vector<40x1xf32>
    %125 = arith.addf %122, %124 : vector<40x1xf32>
    %126 = tpu.reciprocal %125 {approx = true} : vector<40x1xf32> -> vector<40x1xf32>
    %127 = vector.broadcast %126 : vector<40x1xf32> to vector<40x8xf32>
    %128 = arith.mulf %117, %127 : vector<40x8xf32>
    %129 = vector.broadcast %126 : vector<40x1xf32> to vector<40x3xf32>
    %130 = arith.mulf %120, %129 : vector<40x3xf32>
    %131 = arith.truncf %128 : vector<40x8xf32> to vector<40x8xbf16>
    %cst_61 = arith.constant dense<0.000000e+00> : vector<10x8xf32>
    %132 = tpu.matmul %17, %131, %cst_61 {dimension_numbers = #tpu.dot_dimension_numbers<[1], [0], [0], [1], [0, 0, 1, 1], [], []>} : vector<10x40xbf16>, vector<40x8xbf16>, vector<10x8xf32> -> vector<10x8xf32>
    %133 = arith.truncf %132 : vector<10x8xf32> to vector<10x8xbf16>
    %134 = arith.truncf %130 : vector<40x3xf32> to vector<40x3xbf16>
    %cst_62 = arith.constant dense<0.000000e+00> : vector<10x3xf32>
    %135 = tpu.matmul %17, %134, %cst_62 {dimension_numbers = #tpu.dot_dimension_numbers<[1], [0], [0], [1], [0, 0, 1, 1], [], []>} : vector<10x40xbf16>, vector<40x3xbf16>, vector<10x3xf32> -> vector<10x3xf32>
    %136 = arith.truncf %135 : vector<10x3xf32> to vector<10x3xbf16>
    %cst_63 = arith.constant dense<0.000000e+00> : vector<10x32xf32>
    %137 = tpu.matmul %133, %102, %cst_63 {dimension_numbers = #tpu.dot_dimension_numbers<[1], [0], [0], [1], [0, 0, 1, 1], [], []>} : vector<10x8xbf16>, vector<8x32xbf16>, vector<10x32xf32> -> vector<10x32xf32>
    %cst_64 = arith.constant dense<0.000000e+00> : vector<10x32xf32>
    %138 = tpu.matmul %136, %10, %cst_64 {dimension_numbers = #tpu.dot_dimension_numbers<[1], [0], [0], [1], [0, 0, 1, 1], [], []>} : vector<10x3xbf16>, vector<3x32xbf16>, vector<10x32xf32> -> vector<10x32xf32>
    %139 = arith.addf %137, %138 : vector<10x32xf32>
    %c10 = arith.constant 10 : index
    %c0_65 = arith.constant 0 : index
    %140 = vector.load %arg15[%c10, %c0_65] : memref<20x32xf32, #tpu.memory_space<vmem>>, vector<10x32xf32>
    tpu.vector_store %arg15[%c10, %c0_65], %139 {strides = array<i32>} : memref<20x32xf32, #tpu.memory_space<vmem>>, vector<10x32xf32>,
    %141 = arith.truncf %98 : vector<8x32xf32> to vector<8x32xbf16>
    %cst_66 = arith.constant dense<0.000000e+00> : vector<32x32xf32>
    %142 = tpu.matmul %12, %141, %cst_66 {dimension_numbers = #tpu.dot_dimension_numbers<[1], [0], [0], [1], [0, 0, 1, 1], [], []>} : vector<32x8xbf16>, vector<8x32xbf16>, vector<32x32xf32> -> vector<32x32xf32>
    %143 = arith.mulf %142, %13 : vector<32x32xf32>
    %144 = arith.truncf %143 : vector<32x32xf32> to vector<32x32xbf16>
    %cst_67 = arith.constant dense<0.000000e+00> : vector<32x10xf32>
    %145 = tpu.matmul %144, %101, %cst_67 {dimension_numbers = #tpu.dot_dimension_numbers<[1], [1], [0], [0], [0, 0, 1, 0], [], []>} : vector<32x32xbf16>, vector<10x32xbf16>, vector<32x10xf32> -> vector<32x10xf32>
    %cst_68 = arith.constant dense<0.000000e+00> : vector<32x3xf32>
    %146 = tpu.matmul %144, %9, %cst_68 {dimension_numbers = #tpu.dot_dimension_numbers<[1], [1], [0], [0], [0, 0, 1, 0], [], []>} : vector<32x32xbf16>, vector<3x32xbf16>, vector<32x3xf32> -> vector<32x3xf32>
    %cst_69 = arith.constant dense<0xFF800000> : vector<32xf32>
    %147 = vector.multi_reduction <maximumf>, %145, %cst_69 [1] : vector<32x10xf32> to vector<32xf32>
    %148 = vector.shape_cast %147 : vector<32xf32> to vector<32x1xf32>
    %cst_70 = arith.constant dense<0xFF800000> : vector<32xf32>
    %149 = vector.multi_reduction <maximumf>, %146, %cst_70 [1] : vector<32x3xf32> to vector<32xf32>
    %150 = vector.shape_cast %149 : vector<32xf32> to vector<32x1xf32>
    %151 = arith.maximumf %148, %150 : vector<32x1xf32>
    %152 = vector.broadcast %151 : vector<32x1xf32> to vector<32x10xf32>
    %153 = arith.subf %145, %152 : vector<32x10xf32>
    %154 = math.exp %153 : vector<32x10xf32>
    %155 = vector.broadcast %151 : vector<32x1xf32> to vector<32x3xf32>
    %156 = arith.subf %146, %155 : vector<32x3xf32>
    %157 = math.exp %156 : vector<32x3xf32>
    %cst_71 = arith.constant dense<0.000000e+00> : vector<32xf32>
    %158 = vector.multi_reduction <add>, %154, %cst_71 [1] : vector<32x10xf32> to vector<32xf32>
    %159 = vector.shape_cast %158 : vector<32xf32> to vector<32x1xf32>
    %cst_72 = arith.constant dense<0.000000e+00> : vector<32xf32>
    %160 = vector.multi_reduction <add>, %157, %cst_72 [1] : vector<32x3xf32> to vector<32xf32>
    %161 = vector.shape_cast %160 : vector<32xf32> to vector<32x1xf32>
    %162 = arith.addf %159, %161 : vector<32x1xf32>
    %163 = tpu.reciprocal %162 {approx = true} : vector<32x1xf32> -> vector<32x1xf32>
    %164 = vector.broadcast %163 : vector<32x1xf32> to vector<32x10xf32>
    %165 = arith.mulf %154, %164 : vector<32x10xf32>
    %166 = vector.broadcast %163 : vector<32x1xf32> to vector<32x3xf32>
    %167 = arith.mulf %157, %166 : vector<32x3xf32>
    %168 = arith.truncf %165 : vector<32x10xf32> to vector<32x10xbf16>
    %cst_73 = arith.constant dense<0.000000e+00> : vector<8x10xf32>
    %169 = tpu.matmul %14, %168, %cst_73 {dimension_numbers = #tpu.dot_dimension_numbers<[1], [0], [0], [1], [0, 0, 1, 1], [], []>} : vector<8x32xbf16>, vector<32x10xbf16>, vector<8x10xf32> -> vector<8x10xf32>
    %170 = arith.truncf %169 : vector<8x10xf32> to vector<8x10xbf16>
    %171 = arith.truncf %167 : vector<32x3xf32> to vector<32x3xbf16>
    %cst_74 = arith.constant dense<0.000000e+00> : vector<8x3xf32>
    %172 = tpu.matmul %14, %171, %cst_74 {dimension_numbers = #tpu.dot_dimension_numbers<[1], [0], [0], [1], [0, 0, 1, 1], [], []>} : vector<8x32xbf16>, vector<32x3xbf16>, vector<8x3xf32> -> vector<8x3xf32>
    %173 = arith.truncf %172 : vector<8x3xf32> to vector<8x3xbf16>
    %cst_75 = arith.constant dense<0.000000e+00> : vector<8x32xf32>
    %174 = tpu.matmul %170, %103, %cst_75 {dimension_numbers = #tpu.dot_dimension_numbers<[1], [0], [0], [1], [0, 0, 1, 1], [], []>} : vector<8x10xbf16>, vector<10x32xbf16>, vector<8x32xf32> -> vector<8x32xf32>
    %cst_76 = arith.constant dense<0.000000e+00> : vector<8x32xf32>
    %175 = tpu.matmul %173, %11, %cst_76 {dimension_numbers = #tpu.dot_dimension_numbers<[1], [0], [0], [1], [0, 0, 1, 1], [], []>} : vector<8x3xbf16>, vector<3x32xbf16>, vector<8x32xf32> -> vector<8x32xf32>
    %176 = arith.addf %174, %175 : vector<8x32xf32>
    %c8 = arith.constant 8 : index
    %c0_77 = arith.constant 0 : index
    %177 = vector.load %arg16[%c8, %c0_77] : memref<16x32xf32, #tpu.memory_space<vmem>>, vector<8x32xf32>
    tpu.vector_store %arg16[%c8, %c0_77], %176 {strides = array<i32>} : memref<16x32xf32, #tpu.memory_space<vmem>>, vector<8x32xf32>,
    return
  }
  func.func @transform_0(%arg0: i32) -> (i32, i32) {
    %c0_i32 = arith.constant 0 : i32
    %c0_i32_0 = arith.constant 0 : i32
    return %arg0, %c0_i32 : i32, i32
  }
  func.func @transform_1(%arg0: i32) -> (i32, i32) {
    %c0_i32 = arith.constant 0 : i32
    %c0_i32_0 = arith.constant 0 : i32
    return %arg0, %c0_i32 : i32, i32
  }
  func.func @transform_2(%arg0: i32) -> (i32, i32) {
    %c0_i32 = arith.constant 0 : i32
    %c0_i32_0 = arith.constant 0 : i32
    %c0_i32_1 = arith.constant 0 : i32
    return %c0_i32, %c0_i32_0 : i32, i32
  }
  func.func @transform_3(%arg0: i32) -> (i32, i32) {
    %c0_i32 = arith.constant 0 : i32
    %c0_i32_0 = arith.constant 0 : i32
    %c0_i32_1 = arith.constant 0 : i32
    return %c0_i32, %c0_i32_0 : i32, i32
  }
  func.func @transform_4(%arg0: i32) -> (i32, i32) {
    %c0_i32 = arith.constant 0 : i32
    %c0_i32_0 = arith.constant 0 : i32
    %c0_i32_1 = arith.constant 0 : i32
    return %c0_i32, %c0_i32_0 : i32, i32
  }
  func.func @transform_5(%arg0: i32) -> (i32, i32) {
    %c0_i32 = arith.constant 0 : i32
    %c0_i32_0 = arith.constant 0 : i32
    %c0_i32_1 = arith.constant 0 : i32
    return %c0_i32, %c0_i32_0 : i32, i32
  }
  func.func @transform_6(%arg0: i32) -> (i32, i32) {
    %c0_i32 = arith.constant 0 : i32
    %c0_i32_0 = arith.constant 0 : i32
    %c0_i32_1 = arith.constant 0 : i32
    return %c0_i32, %c0_i32_0 : i32, i32
  }
  func.func @transform_7(%arg0: i32) -> (i32, i32) {
    %c0_i32 = arith.constant 0 : i32
    %c0_i32_0 = arith.constant 0 : i32
    %c0_i32_1 = arith.constant 0 : i32
    return %c0_i32, %c0_i32_0 : i32, i32
  }
  func.func @transform_8(%arg0: i32) -> (i32, i32) {
    %c0_i32 = arith.constant 0 : i32
    %c0_i32_0 = arith.constant 0 : i32
    %c0_i32_1 = arith.constant 0 : i32
    return %c0_i32, %c0_i32_0 : i32, i32
  }
  func.func @transform_9(%arg0: i32) -> (i32, i32) {
    %c0_i32 = arith.constant 0 : i32
    %c0_i32_0 = arith.constant 0 : i32
    %c0_i32_1 = arith.constant 0 : i32
    return %c0_i32, %c0_i32_0 : i32, i32
  }
  func.func @transform_10(%arg0: i32) -> (i32, i32) {
    %c0_i32 = arith.constant 0 : i32
    %c0_i32_0 = arith.constant 0 : i32
    %c0_i32_1 = arith.constant 0 : i32
    return %c0_i32, %c0_i32_0 : i32, i32
  }
  func.func @transform_11(%arg0: i32) -> (i32, i32) {
    %c0_i32 = arith.constant 0 : i32
    %c0_i32_0 = arith.constant 0 : i32
    %c0_i32_1 = arith.constant 0 : i32
    return %c0_i32, %c0_i32_0 : i32, i32
  }
  func.func @transform_12(%arg0: i32) -> (i32, i32) {
    %c0_i32 = arith.constant 0 : i32
    %c0_i32_0 = arith.constant 0 : i32
    %c0_i32_1 = arith.constant 0 : i32
    return %c0_i32, %c0_i32_0 : i32, i32
  }
  func.func @transform_13(%arg0: i32) -> (i32, i32) {
    %c0_i32 = arith.constant 0 : i32
    %c0_i32_0 = arith.constant 0 : i32
    %c0_i32_1 = arith.constant 0 : i32
    return %c0_i32, %c0_i32_0 : i32, i32
  }
  func.func @transform_14(%arg0: i32) -> (i32, i32) {
    %c0_i32 = arith.constant 0 : i32
    %c0_i32_0 = arith.constant 0 : i32
    return %arg0, %c0_i32 : i32, i32
  }
  func.func @transform_15(%arg0: i32) -> (i32, i32) {
    %c0_i32 = arith.constant 0 : i32
    %c0_i32_0 = arith.constant 0 : i32
    return %arg0, %c0_i32 : i32, i32
  }
}

</mosaic_0001>

<bundles_post_ra>
// kernel: dense_coattn.1
= control target key start
LH: loop header
LB: loop body
LE: loop exit
PB: predicated region body
PF: predicated region fallthrough
CT: control target
= control target key end

     0   :  { %vm75_vm0 = vcmask 261120   ;;  %v2731_v5 = vmov 0.0   ;;  %vm2732_vm1 = vmmov 0   ;;  %s3370_s0 = inlined_call_operand.vmem [shape: f32[16,32], index: 0, kind: input, shape index: {}]   ;;  %s3371_s1 = inlined_call_operand.vmem [shape: f32[20,32], index: 1, kind: input, shape index: {}]   ;;  %s3372_s2 = inlined_call_operand.vmem [shape: bf16[32,32], index: 2, kind: input, shape index: {}]   ;;  %s3373_s3 = inlined_call_operand.vmem [shape: bf16[32,32], index: 3, kind: input, shape index: {}]   ;;  %s3374_s4 = inlined_call_operand.vmem [shape: bf16[3,32], index: 4, kind: input, shape index: {}]   ;;  %s3375_s5 = inlined_call_operand.vmem [shape: bf16[3,32], index: 5, kind: input, shape index: {}]   ;;  %s3376_s6 = inlined_call_operand.vmem [shape: bf16[3,32], index: 6, kind: input, shape index: {}]   ;;  %s3377_s7 = inlined_call_operand.vmem [shape: bf16[3,32], index: 7, kind: input, shape index: {}]   ;;  %s3378_s8 = inlined_call_operand.vmem [shape: bf16[32,8], index: 8, kind: input, shape index: {}]   ;;  %s3379_s9 = inlined_call_operand.vmem [shape: f32[32,32], index: 9, kind: input, shape index: {}]   ;;  %s3380_s10 = inlined_call_operand.vmem [shape: bf16[8,32], index: 10, kind: input, shape index: {}]   ;;  %s3381_s11 = inlined_call_operand.vmem [shape: bf16[40,10], index: 11, kind: input, shape index: {}]   ;;  %s3382_s12 = inlined_call_operand.vmem [shape: f32[40,32], index: 12, kind: input, shape index: {}]   ;;  %s3383_s13 = inlined_call_operand.vmem [shape: bf16[10,40], index: 13, kind: input, shape index: {}]   ;;  %s3384_s14 = inlined_call_operand.vmem [shape: f32[20,32], index: 14, kind: output, shape index: {0}]   ;;  %s3385_s15 = inlined_call_operand.hbm [shape: f32[16,32], index: 15, kind: output, shape index: {1}]  }
   0x1   :  { %v2591_v0 = vld [vmem:[%s3373_s3 + $0x8] sm:$0xff]   ;;  %v2592_v1 = vld [vmem:[%s3373_s3] sm:$0xff]   ;;  %v56_v4 = vld [vmem:[%s3371_s1 + $0x10] sm:$0xf]  ;;  %2323 = vmatprep.subr.bf16.mxu0 %v2731_v5  ;;  %2327 = vmatprep.mubr.msk.bf16.mxu0 %vm2732_vm1, %v2731_v5 }
   0x2   :  { %2331 = vmatprep.subr.bf16.mxu1 %v2591_v0  ;;  %v54_v2 = vld [vmem:[%s3371_s1] sm:$0xff]  ;;  %v55_v3 = vld [vmem:[%s3371_s1 + $0x8] sm:$0xff]  ;;  %v2851_v11 = vpack.c.bf16 %v56_v4, %v56_v4 }
   0x3   :  { %2332 = vmatpush3.bf16.msra.mxu1 %v2591_v0  ;;  %v2833_v6 = vpack.c.bf16 %v55_v3, %v54_v2  ;;  %v2593_v7 = vld [vmem:[%s3372_s2 + $0x8] sm:$0xff]   ;;  %v2594_v8 = vld [vmem:[%s3372_s2] sm:$0xff]  }
   0x4   :  { %2333 = vmatprep.subr.bf16.mxu1 %v2592_v1  ;;  %2324 = vmatpush3.bf16.msra.mxu0 %v2593_v7  ;;  %v51_v9 = vld [vmem:[%s3370_s0] sm:$0xff]  ;;  %v52_v10 = vld [vmem:[%s3370_s0 + $0x8] sm:$0xff] }
   0x5   :  { %2335 = vmatprep.mubr.msk.bf16.mxu1 %vm75_vm0, %v2833_v6  ;;  %2325 = vmatprep.subr.bf16.mxu0 %v2731_v5  ;;  %v2854_v12 = vpack.c.bf16 %v52_v10, %v51_v9 }
   0x7   :  { %2334 = vmatpush3.bf16.msra.mxu1 %v2592_v1 }
   0x8   :  { %2353 = vmatprep.subr.bf16.mxu1 %v2731_v5  ;;  %2326 = vmatpush3.bf16.msra.mxu0 %v2594_v8 }
   0x9   :  { %21 = vsyncpa [#allocation3], 0  ;;  %2339 = vmatprep.subr.bf16.mxu0 %v2731_v5  ;;  %vm240_vm2 = vcmask 1044480   ;;  %v190_v24 = vld [vmem:[%s3374_s4] sm:$0x3]  ;;  %vm230_vm3 = vcmask 80896  }
   0xa   :  { %2336 = vmatmul.mubr.msk.bf16.vlgmr.msra.gmra.mxu1 %vm75_vm0, %v2851_v11  ;;  %v2888_v26 = vld [vmem:[%s3381_s11] sm:$0xff]   ;;  %v2892_v27 = vsel %vm75_vm0, %v190_v24, 0  ;;  %v2903_v28 = vld [vmem:[%s3381_s11 + $0x8] sm:$0xff]   ;;  %v2912_v29 = vld [vmem:[%s3381_s11 + $0x10] ss:$0 sps:$4 sm:$0xff]   ;;  %vm564_vm4 = vcmask 1043456  }
   0xb   :  { %2355 = vmatprep.mubr.msk.bf16.mxu1 %vm2732_vm1, %v2731_v5  ;;  %2328 = vmatmul.mubr.msk.bf16.vlgmr.msra.gmra.mxu0 %vm75_vm0, %v2854_v12  ;;  %v2921_v31 = vld [vmem:[%s3382_s12] sm:$0xff]  ;;  %v2926_v33 = vld [vmem:[%s3382_s12 + $0x8] sm:$0xff]  ;;  %v712_v39 = vsel %vm564_vm4, %v2854_v12, 0  ;;  %v2937_v41 = vld [vmem:[%s3382_s12 + $0x10] sm:$0xff]  ;;  %vm435_vm5 = vcmask 64512   ;;  %vm451_vm6 = vcmask 23552  }
   0xc   :  { %2341 = vmatprep.mubr.msk.bf16.mxu0 %vm2732_vm1, %v2731_v5  ;;  %v2942_v43 = vld [vmem:[%s3382_s12 + $0x18] sm:$0xff]  ;;  %v2955_v48 = vld [vmem:[%s3382_s12 + $0x20] sm:$0xff]  ;;  %vm560_vm7 = vcmask 326656   ;;  %vm661_vm8 = vcmask 1040384   ;;  %vm662_vm9 = vcmask 1041408   ;;  %vm756_vm10 = vcmask 254976  }
   0xd   :  { %vm2100_vm11 = vcmask 1042432  }
  0xca   :  { %v2866_v13 = vpop.f32.mrf.mxu1 }
  0xcb   :  { %v113_v15 = vpop.f32.mrf.mxu0 }
  0xcc   :  { %v176_v14 = vpop.f32.mrf.mxu1  ;;  %v2868_v16 = vpack.c.bf16 %v113_v15, %v113_v15 }
  0xcd   :  { %v2329_v18 = vpop.f32.mrf.mxu0 }
  0xce   :  { %v2338_v17 = vpop.f32.mrf.mxu1  ;;  %v318_v19 = vsel %vm75_vm0, %v2868_v16, 0 }
  0xcf   :  { %v2874_v21 = vpop.f32.mrf.mxu0  ;;  %2354 = vmatpush3.bf16.xpose.msra.mxu1 %v318_v19 }
  0xd0   :  { %v2872_v20 = vpop.f32.mrf.mxu1  ;;  %2381 = vmatprep.subr.bf16.mxu1 %v2731_v5 }
  0xd1   :  { %v2877_v22 = vpack.c.bf16 %v2872_v20, %v176_v14  ;;  %v2330_v23 = vpop.f32.mrf.mxu0 }
  0xd3   :  { %v242_v25 = vsel %vm240_vm2, %v2877_v22, 0 }
  0xd4   :  { %2340 = vmatpush3.bf16.msra.mxu0 %v242_v25 }
  0xd5   :  { %2367 = vmatprep.subr.bf16.mxu0 %v2731_v5 }
  0xd7   :  { %2342 = vmatmul.mubr.msk.bf16.vlgmr.msra.gmra.mxu0 %vm230_vm3, %v2888_v26 }
  0xd8   :  { %2345 = vmatprep.mubr.msk.bf16.mxu0 %vm2732_vm1, %v2731_v5  ;;  %2368 = vmatpush3.bf16.xpose.msra.mxu0 %v2892_v27 }
  0xd9   :  { %2407 = vmatprep.subr.bf16.mxu0 %v2731_v5 }
  0xdf   :  { %2346 = vmatmul.mubr.msk.bf16.gmra.mxu0 %vm230_vm3, %v2903_v28 }
  0xe0   :  { %2349 = vmatprep.mubr.msk.bf16.mxu0 %vm2732_vm1, %v2731_v5 }
  0xe7   :  { %2350 = vmatmul.mubr.msk.bf16.gmra.mxu0 %vm230_vm3, %v2912_v29 }
  0xe8   :  { %2369 = vmatprep.mubr.msk.bf16.mxu0 %vm2732_vm1, %v2731_v5 }
 0x197   :  { %v278_v30 = vpop.f32.mrf.mxu0 }
 0x198   :  { %v300_v35 = vmul.f32 %v278_v30, %v2921_v31 }
 0x199   :  { %v2343_v32 = vpop.f32.mrf.mxu0 }
 0x19b   :  { %v281_v34 = vpop.f32.mrf.mxu0 }
 0x19c   :  { %v301_v36 = vmul.f32 %v281_v34, %v2926_v33 }
 0x19d   :  { %v2344_v37 = vpop.f32.mrf.mxu0 }
 0x19e   :  { %v305_v38 = vpack.c.bf16 %v301_v36, %v300_v35 }
 0x19f   :  { %v286_v40 = vpop.f32.mrf.mxu0 }
 0x1a0   :  { %2356 = vmatmul.mubr.msk.bf16.vlgmr.msra.gmra.mxu1 %vm75_vm0, %v305_v38  ;;  %2370 = vmatmul.mubr.msk.bf16.vlgmr.msra.gmra.mxu0 %vm75_vm0, %v305_v38  ;;  %v302_v45 = vmul.f32 %v286_v40, %v2937_v41 }
 0x1a1   :  { %2408 = vmatpush3.bf16.msra.mxu0 %v712_v39  ;;  %v2347_v42 = vpop.f32.mrf.mxu0  ;;  %2359 = vmatprep.mubr.msk.bf16.mxu1 %vm2732_vm1, %v2731_v5 }
 0x1a2   :  { %2580 = vmatprep.subr.msk.bf16.mxu0 %vm75_vm0, %v2877_v22  ;;  %2373 = vmatprep.mubr.msk.bf16.mxu0 %vm2732_vm1, %v2731_v5 }
 0x1a3   :  { %v289_v44 = vpop.f32.mrf.mxu0 }
 0x1a4   :  { %v303_v46 = vmul.f32 %v289_v44, %v2942_v43 }
 0x1a5   :  { %v2348_v47 = vpop.f32.mrf.mxu0 }
 0x1a6   :  { %v306_v49 = vpack.c.bf16 %v303_v46, %v302_v45 }
 0x1a7   :  { %v294_v50 = vpop.f32.mrf.mxu0 }
 0x1a8   :  { %v304_v51 = vmul.f32 %v294_v50, %v2955_v48  ;;  %2360 = vmatmul.mubr.msk.bf16.gmra.mxu1 %vm75_vm0, %v306_v49  ;;  %2374 = vmatmul.mubr.msk.bf16.gmra.mxu0 %vm75_vm0, %v306_v49 }
 0x1a9   :  { %v2351_v52 = vpop.f32.mrf.mxu0  ;;  %2363 = vmatprep.mubr.msk.bf16.mxu1 %vm2732_vm1, %v2731_v5  ;;  %2377 = vmatprep.mubr.msk.bf16.mxu0 %vm2732_vm1, %v2731_v5 }
 0x1aa   :  { %v307_v54 = vpack.c.bf16 %v304_v51, %v304_v51 }
 0x1ab   :  { %v297_v53 = vpop.f32.mrf.mxu0 }
 0x1ad   :  { %v2352_v55 = vpop.f32.mrf.mxu0 }
 0x1b0   :  { %2364 = vmatmul.mubr.msk.bf16.gmra.mxu1 %vm75_vm0, %v307_v54  ;;  %2378 = vmatmul.mubr.msk.bf16.gmra.mxu0 %vm75_vm0, %v307_v54 }
 0x1b1   :  { %2387 = vmatprep.mubr.msk.bf16.mxu1 %vm2732_vm1, %v2731_v5  ;;  %2409 = vmatprep.mubr.msk.bf16.mxu0 %vm2732_vm1, %v2731_v5 }
 0x260   :  { %v2970_v56 = vpop.f32.mrf.mxu1  ;;  %v2972_v57 = vpop.f32.mrf.mxu0 }
 0x261   :  { %v436_v39 = vsel %vm435_vm5, %v2970_v56, -inf  ;;  %v452_v40 = vsel %vm451_vm6, %v2972_v57, -inf }
 0x262   :  { %v2357_v58 = vpop.f32.mrf.mxu1  ;;  %v2371_v59 = vpop.f32.mrf.mxu0 }
 0x264   :  { %v2974_v60 = vpop.f32.mrf.mxu1  ;;  %v2976_v61 = vpop.f32.mrf.mxu0 }
 0x265   :  { %v439_v32 = vsel %vm435_vm5, %v2974_v60, -inf  ;;  %v455_v37 = vsel %vm451_vm6, %v2976_v61, -inf }
 0x266   :  { %v2358_v62 = vpop.f32.mrf.mxu1  ;;  %v2372_v63 = vpop.f32.mrf.mxu0 }
 0x268   :  { %v362_v0 = vpop.f32.mrf.mxu1  ;;  %v2978_v1 = vpop.f32.mrf.mxu0 }
 0x269   :  { %v442_v2 = vsel %vm435_vm5, %v362_v0, -inf  ;;  %v458_v38 = vsel %vm451_vm6, %v2978_v1, -inf }
 0x26a   :  { %443 = vmax.xlane.f32.xlu1 %v442_v2  ;;  %v2361_v3 = vpop.f32.mrf.mxu1  ;;  %v2375_v4 = vpop.f32.mrf.mxu0 }
 0x26c   :  { %v365_v7 = vpop.f32.mrf.mxu1  ;;  %v424_v8 = vpop.f32.mrf.mxu0 }
 0x26d   :  { %v445_v9 = vsel %vm435_vm5, %v365_v7, -inf  ;;  %v461_v19 = vsel %vm451_vm6, %v424_v8, -inf }
 0x26e   :  { %446 = vmax.xlane.f32.xlu1 %v445_v9  ;;  %v2362_v10 = vpop.f32.mrf.mxu1  ;;  %v2376_v14 = vpop.f32.mrf.mxu0 }
 0x270   :  { %v370_v15 = vpop.f32.mrf.mxu1  ;;  %v429_v17 = vpop.f32.mrf.mxu0 }
 0x271   :  { %v448_v18 = vsel %vm435_vm5, %v370_v15, -inf  ;;  %v464_v34 = vsel %vm451_vm6, %v429_v17, -inf }
 0x272   :  { %449 = vmax.xlane.f32.xlu0 %v448_v18  ;;  %v2365_v23 = vpop.f32.mrf.mxu1  ;;  %462 = vmax.xlane.f32.xlu1 %v461_v19  ;;  %v2379_v24 = vpop.f32.mrf.mxu0 }
 0x274   :  { %v373_v25 = vpop.f32.mrf.mxu1  ;;  %v432_v30 = vpop.f32.mrf.mxu0 }
 0x276   :  { %v2366_v35 = vpop.f32.mrf.mxu1  ;;  %440 = vmax.xlane.f32.xlu1 %v439_v32  ;;  %465 = vmax.xlane.f32.xlu0 %v464_v34  ;;  %v2380_v36 = vpop.f32.mrf.mxu0 }
 0x27a   :  { %456 = vmax.xlane.f32.xlu1 %v455_v37  ;;  %459 = vmax.xlane.f32.xlu0 %v458_v38 }
 0x27e   :  { %437 = vmax.xlane.f32.xlu0 %v436_v39 }
 0x282   :  { %453 = vmax.xlane.f32.xlu0 %v452_v40 }
 0x2f3   :  { %v444_v42 = vpop.xlane.xlu1 %443 }
 0x2f7   :  { %v447_v44 = vpop.xlane.xlu1 %446 }
 0x2fb   :  { %v450_v45 = vpop.xlane.xlu0 %449  ;;  %v463_v46 = vpop.xlane.xlu1 %462 }
 0x2fc   :  { %v470_v47 = vmax.f32 %v447_v44, %v463_v46 }
 0x2fe   :  { %v475_v49 = vsub.f32 %v365_v7, %v470_v47  ;;  %v490_v54 = vsub.f32 %v424_v8, %v470_v47 }
 0x2ff   :  { %v441_v50 = vpop.xlane.xlu1 %440  ;;  %v466_v51 = vpop.xlane.xlu0 %465 }
 0x300   :  { %v483_v52 = vmul.f32 1.442695, %v475_v49  ;;  %v471_v53 = vmax.f32 %v450_v45, %v466_v51  ;;  %v498_v3 = vmul.f32 1.442695, %v490_v54 }
 0x302   :  { %2601 = vpow2.f32 %v483_v52  ;;  %v491_v55 = vsub.f32 %v429_v17, %v471_v53  ;;  %v476_v4 = vsub.f32 %v370_v15, %v471_v53 }
 0x303   :  { %v457_v58 = vpop.xlane.xlu1 %456  ;;  %v460_v59 = vpop.xlane.xlu0 %459 }
 0x304   :  { %v500_v62 = vmul.f32 1.442695, %v491_v55  ;;  %v468_v63 = vmax.f32 %v441_v50, %v457_v58  ;;  %v469_v2 = vmax.f32 %v444_v42, %v460_v59  ;;  %v485_v8 = vmul.f32 1.442695, %v476_v4 }
 0x306   :  { %v473_v9 = vsub.f32 %v2974_v60, %v468_v63  ;;  %v474_v10 = vsub.f32 %v362_v0, %v469_v2  ;;  %2603 = vpow2.f32 %v500_v62  ;;  %v488_v19 = vsub.f32 %v2976_v61, %v468_v63 }
 0x307   :  { %v438_v14 = vpop.xlane.xlu0 %437  ;;  %2605 = vpow2.f32 %v498_v3  ;;  %v489_v17 = vsub.f32 %v2978_v1, %v469_v2 }
 0x308   :  { %v481_v7 = vmul.f32 1.442695, %v474_v10  ;;  %v479_v18 = vmul.f32 1.442695, %v473_v9  ;;  %v494_v25 = vmul.f32 1.442695, %v488_v19 }
 0x309   :  { %v496_v15 = vmul.f32 1.442695, %v489_v17 }
 0x30a   :  { %2607 = vpow2.f32 %v481_v7 }
 0x30b   :  { %v454_v23 = vpop.xlane.xlu0 %453  ;;  %2609 = vpow2.f32 %v479_v18 }
 0x30c   :  { %v467_v24 = vmax.f32 %v438_v14, %v454_v23  ;;  %2611 = vpow2.f32 %v485_v8 }
 0x30d   :  { %2613 = vpow2.f32 %v494_v25 }
 0x30e   :  { %v472_v60 = vsub.f32 %v2970_v56, %v467_v24  ;;  %2615 = vpow2.f32 %v496_v15  ;;  %v487_v1 = vsub.f32 %v2972_v57, %v467_v24 }
 0x30f   :  { %v2999_v0 = vpop.eup %2601 }
 0x310   :  { %v511_v30 = vsel %vm435_vm5, %v2999_v0, 0.0  ;;  %v477_v61 = vmul.f32 1.442695, %v472_v60  ;;  %v492_v56 = vmul.f32 1.442695, %v487_v1 }
 0x311   :  { %512 = vadd.xlane.f32.xlu1 %v511_v30 }
 0x312   :  { %2617 = vpow2.f32 %v477_v61 }
 0x313   :  { %v3004_v32 = vpop.eup %2603  ;;  %2619 = vpow2.f32 %v492_v56 }
 0x314   :  { %v529_v34 = vsel %vm451_vm6, %v3004_v32, 0.0  ;;  %v3008_v35 = vpop.eup %2605 }
 0x315   :  { %530 = vadd.xlane.f32.xlu1 %v529_v34  ;;  %v526_v37 = vsel %vm451_vm6, %v3008_v35, 0.0 }
 0x317   :  { %v2608_v36 = vpop.eup %2607 }
 0x318   :  { %v2610_v38 = vpop.eup %2609  ;;  %v508_v39 = vsel %vm435_vm5, %v2608_v36, 0.0 }
 0x319   :  { %527 = vadd.xlane.f32.xlu1 %v526_v37  ;;  %v2612_v57 = vpop.eup %2611  ;;  %509 = vadd.xlane.f32.xlu0 %v508_v39  ;;  %v505_v40 = vsel %vm435_vm5, %v2610_v38, 0.0 }
 0x31a   :  { %v3014_v42 = vpop.eup %2613  ;;  %v514_v44 = vsel %vm435_vm5, %v2612_v57, 0.0 }
 0x31b   :  { %v2616_v45 = vpop.eup %2615  ;;  %v520_v46 = vsel %vm451_vm6, %v3014_v42, 0.0 }
 0x31c   :  { %v523_v47 = vsel %vm451_vm6, %v2616_v45, 0.0 }
 0x31d   :  { %506 = vadd.xlane.f32.xlu1 %v505_v40  ;;  %515 = vadd.xlane.f32.xlu0 %v514_v44 }
 0x31f   :  { %v2618_v49 = vpop.eup %2617 }
 0x320   :  { %v502_v50 = vsel %vm435_vm5, %v2618_v49, 0.0  ;;  %v2620_v51 = vpop.eup %2619 }
 0x321   :  { %521 = vadd.xlane.f32.xlu1 %v520_v46  ;;  %524 = vadd.xlane.f32.xlu0 %v523_v47  ;;  %v517_v52 = vsel %vm451_vm6, %v2620_v51, 0.0  ;;  %v2733_v46 = vmov 65535  }
 0x322   :  { %v663_v47 = vsel %vm661_vm8, 4294967295, %v2733_v46 }
 0x325   :  { %503 = vadd.xlane.f32.xlu0 %v502_v50 }
 0x329   :  { %518 = vadd.xlane.f32.xlu0 %v517_v52 }
 0x39a   :  { %v513_v53 = vpop.xlane.xlu1 %512 }
 0x39e   :  { %v531_v54 = vpop.xlane.xlu1 %530 }
 0x3a2   :  { %v528_v55 = vpop.xlane.xlu1 %527  ;;  %v510_v58 = vpop.xlane.xlu0 %509 }
 0x3a3   :  { %v535_v63 = vadd.f32 %v528_v55, %v513_v53 }
 0x3a6   :  { %v507_v59 = vpop.xlane.xlu1 %506  ;;  %v516_v62 = vpop.xlane.xlu0 %515 }
 0x3a7   :  { %v536_v2 = vadd.f32 %v531_v54, %v516_v62 }
 0x3a9   :  { %2621 = vrcp.f32 %v536_v2  ;;  %v3065_v2 = vld [vmem:[%s3378_s8] sm:$0xff]  }
 0x3aa   :  { %v525_v3 = vpop.xlane.xlu0 %524  ;;  %2623 = vrcp.f32 %v535_v63  ;;  %v522_v9 = vpop.xlane.xlu1 %521 }
 0x3ab   :  { %v534_v4 = vadd.f32 %v525_v3, %v510_v58  ;;  %v533_v14 = vadd.f32 %v522_v9, %v507_v59  ;;  %v837_v58 = vsel %vm75_vm0, %v2877_v22, 0  ;;  %v774_v9 = vsel %vm564_vm4, %v2868_v16, 0  ;;  %v3075_v22 = vld [vmem:[%s3378_s8 + $0x8] sm:$0xff]  }
 0x3ad   :  { %2625 = vrcp.f32 %v534_v4 }
 0x3ae   :  { %v504_v10 = vpop.xlane.xlu0 %503  ;;  %2627 = vrcp.f32 %v533_v14 }
 0x3b2   :  { %v519_v7 = vpop.xlane.xlu0 %518 }
 0x3b3   :  { %v532_v18 = vadd.f32 %v519_v7, %v504_v10  ;;  %v3082_v10 = vld [vmem:[%s3375_s5] sm:$0x3] }
 0x3b5   :  { %2629 = vrcp.f32 %v532_v18 }
 0x3b6   :  { %v2622_v19 = vpop.eup %2621 }
 0x3b7   :  { %v546_v8 = vmul.f32 %v2622_v19, %v2612_v57  ;;  %v2624_v17 = vpop.eup %2623  ;;  %v551_v34 = vmul.f32 %v2622_v19, %v3004_v32 }
 0x3b8   :  { %v545_v60 = vmul.f32 %v2624_v17, %v2999_v0  ;;  %v550_v32 = vmul.f32 %v2624_v17, %v3008_v35  ;;  %v3045_v35 = vsel %vm662_vm9, %v663_v47, 0 }
 0x3b9   :  { %v554_v23 = vpack.c.bf16 %v546_v8, %v546_v8  ;;  %v612_v0 = vpack.c.bf16 %v551_v34, %v551_v34 }
 0x3ba   :  { %v2626_v24 = vpop.eup %2625 }
 0x3bb   :  { %v566_v25 = vsel %vm564_vm4, %v554_v23, 0  ;;  %v544_v15 = vmul.f32 %v2626_v24, %v2608_v36  ;;  %v2628_v61 = vpop.eup %2627  ;;  %v3030_v36 = vld [vmem:[%s3383_s13] sm:$0x1f]   ;;  %v549_v57 = vmul.f32 %v2626_v24, %v2616_v45  ;;  %v614_v40 = vsel %vm564_vm4, %v612_v0, 0 }
 0x3bc   :  { %2382 = vmatpush3.bf16.msra.mxu1 %v566_v25  ;;  %v543_v37 = vmul.f32 %v2628_v61, %v2610_v38  ;;  %v548_v45 = vmul.f32 %v2628_v61, %v3014_v42  ;;  %v3103_v61 = vld [vmem:[%s3379_s9 + $0x18] sm:$0xff] }
 0x3bd   :  { %2383 = vmatprep.subr.bf16.mxu1 %v2731_v5  ;;  %v553_v30 = vpack.c.bf16 %v545_v60, %v544_v15  ;;  %v611_v38 = vpack.c.bf16 %v550_v32, %v549_v57 }
 0x3c0   :  { %2384 = vmatpush3.bf16.msra.mxu1 %v553_v30 }
 0x3c1   :  { %2385 = vmatprep.subr.bf16.mxu1 %v2731_v5 }
 0x3c2   :  { %v2630_v1 = vpop.eup %2629 }
 0x3c3   :  { %v542_v56 = vmul.f32 %v2630_v1, %v2618_v49  ;;  %v547_v44 = vmul.f32 %v2630_v1, %v2620_v51  ;;  %v192_v49 = vld [vmem:[%s3376_s6] sm:$0x3] }
 0x3c4   :  { %v3048_v52 = vand.u32 %v3045_v35, %v192_v49  ;;  %v3108_v1 = vld [vmem:[%s3379_s9] sm:$0xff] }
 0x3c5   :  { %v552_v39 = vpack.c.bf16 %v543_v37, %v542_v56  ;;  %v610_v50 = vpack.c.bf16 %v548_v45, %v547_v44  ;;  %v3113_v56 = vld [vmem:[%s3379_s9 + $0x8] sm:$0xff]  ;;  %v3118_v37 = vld [vmem:[%s3379_s9 + $0x10] sm:$0xff] }
 0x3c7   :  { %2386 = vmatpush3.bf16.msra.mxu1 %v552_v39 }
 0x3c8   :  { %2391 = vmatprep.subr.bf16.mxu1 %v2731_v5 }
 0x3ca   :  { %2388 = vmatmul.mubr.msk.bf16.vlgmr.msra.gmra.mxu1 %vm560_vm7, %v3030_v36 }
 0x3cb   :  { %2392 = vmatpush3.bf16.msra.mxu1 %v614_v40  ;;  %2397 = vmatprep.mubr.msk.bf16.mxu1 %vm2732_vm1, %v2731_v5 }
 0x3cc   :  { %2393 = vmatprep.subr.bf16.mxu1 %v2731_v5 }
 0x3cf   :  { %2394 = vmatpush3.bf16.msra.mxu1 %v611_v38 }
 0x3d0   :  { %2395 = vmatprep.subr.bf16.mxu1 %v2731_v5 }
 0x3d3   :  { %2396 = vmatpush3.bf16.msra.mxu1 %v610_v50 }
 0x3d4   :  { %2401 = vmatprep.subr.bf16.mxu1 %v2731_v5 }
 0x3d6   :  { %2398 = vmatmul.mubr.msk.bf16.vlgmr.msra.gmra.mxu1 %vm560_vm7, %v3030_v36 }
 0x3d7   :  { %2402 = vmatpush3.bf16.msra.mxu1 %v3048_v52  ;;  %2403 = vmatprep.mubr.msk.bf16.mxu1 %vm2732_vm1, %v2731_v5 }
 0x3d8   :  { %2579 = vmatprep.subr.msk.bf16.mxu1 %vm564_vm4, %v2868_v16  ;;  %v3088_v16 = vsel %vm75_vm0, %v3082_v10, 0 }
 0x48a   :  { %v602_v42 = vpop.f32.mrf.mxu1 }
 0x48c   :  { %v2389_v51 = vpop.f32.mrf.mxu1 }
 0x48e   :  { %v605_v53 = vpop.f32.mrf.mxu1 }
 0x48f   :  { %v609_v54 = vpack.c.bf16 %v605_v53, %v602_v42 }
 0x490   :  { %v2390_v55 = vpop.f32.mrf.mxu1 }
 0x491   :  { %2410 = vmatmul.mubr.msk.bf16.vlgmr.msra.gmra.mxu0 %vm435_vm5, %v609_v54 }
 0x492   :  { %2420 = vmatpush3.bf16.xpose.msra.mxu0 %v837_v58 }
 0x493   :  { %2431 = vmatprep.subr.bf16.mxu0 %v2731_v5 }
 0x496   :  { %v650_v59 = vpop.f32.mrf.mxu1 }
 0x498   :  { %v2399_v62 = vpop.f32.mrf.mxu1 }
 0x49a   :  { %v653_v63 = vpop.f32.mrf.mxu1 }
 0x49b   :  { %v657_v3 = vpack.c.bf16 %v653_v63, %v650_v59 }
 0x49c   :  { %v2400_v4 = vpop.f32.mrf.mxu1 }
 0x49d   :  { %2404 = vmatmul.mubr.msk.bf16.vlgmr.msra.gmra.mxu1 %vm451_vm6, %v657_v3 }
 0x49e   :  { %2414 = vmatpush3.bf16.msra.mxu1 %v774_v9  ;;  %2415 = vmatprep.mubr.msk.bf16.mxu1 %vm435_vm5, %v3065_v2 }
 0x49f   :  { %2581 = vmatprep.subr.msk.bf16.mxu1 %vm75_vm0, %v3082_v10 }
 0x4a5   :  { %2416 = vmatmul.mubr.msk.bf16.vlgmr.msra.gmra.mxu1 %vm435_vm5, %v3075_v22 }
 0x4a6   :  { %2426 = vmatpush3.bf16.xpose.msra.mxu1 %v3088_v16 }
 0x4a7   :  { %2439 = vmatprep.subr.bf16.mxu1 %v2731_v5 }
 0x551   :  { %v748_v14 = vpop.f32.mrf.mxu0 }
 0x553   :  { %v2411_v7 = vpop.f32.mrf.mxu0 }
 0x555   :  { %v751_v18 = vpop.f32.mrf.mxu0 }
 0x557   :  { %v2412_v19 = vpop.f32.mrf.mxu0 }
 0x55d   :  { %v702_v8 = vpop.f32.mrf.mxu1 }
 0x55e   :  { %v749_v17 = vadd.f32 %v748_v14, %v702_v8 }
 0x55f   :  { %v2405_v23 = vpop.f32.mrf.mxu1 }
 0x560   :  { %755 = vst.msk [vmem:[%s3384_s14] sm:$0xff] %vm75_vm0, %v749_v17 }
 0x561   :  { %v705_v24 = vpop.f32.mrf.mxu1 }
 0x562   :  { %v752_v25 = vadd.f32 %v751_v18, %v705_v24 }
 0x563   :  { %v2406_v15 = vpop.f32.mrf.mxu1 }
 0x564   :  { %757 = vst.msk [vmem:[%s3384_s14 + $0x8] sm:$0x3] %vm756_vm10, %v752_v25 }
 0x565   :  { %v2417_v60 = vpop.f32.mrf.mxu1 }
 0x566   :  { %v827_v32 = vmul.f32 %v2417_v60, %v3118_v37 }
 0x567   :  { %v810_v30 = vpop.f32.mrf.mxu1 }
 0x568   :  { %v825_v57 = vmul.f32 %v810_v30, %v3108_v1 }
 0x569   :  { %v2418_v34 = vpop.f32.mrf.mxu1 }
 0x56a   :  { %v828_v39 = vmul.f32 %v2418_v34, %v3103_v61 }
 0x56b   :  { %v813_v0 = vpop.f32.mrf.mxu1 }
 0x56c   :  { %v826_v40 = vmul.f32 %v813_v0, %v3113_v56  ;;  %v830_v44 = vpack.c.bf16 %v828_v39, %v827_v32 }
 0x56e   :  { %v829_v38 = vpack.c.bf16 %v826_v40, %v825_v57 }
 0x570   :  { %2421 = vmatprep.mubr.msk.bf16.mxu0 %vm75_vm0, %v829_v38  ;;  %2427 = vmatprep.mubr.msk.bf16.mxu1 %vm75_vm0, %v829_v38 }
 0x571   :  { %2422 = vmatmul.mubr.msk.bf16.vlgmr.msra.gmra.mxu0 %vm75_vm0, %v830_v44  ;;  %2428 = vmatmul.mubr.msk.bf16.vlgmr.msra.gmra.mxu1 %vm75_vm0, %v830_v44 }
 0x572   :  { %2435 = vmatprep.mubr.msk.bf16.mxu0 %vm2732_vm1, %v2731_v5  ;;  %2443 = vmatprep.mubr.msk.bf16.mxu1 %vm2732_vm1, %v2731_v5 }
 0x631   :  { %v2423_v46 = vpop.f32.mrf.mxu0  ;;  %v2429_v47 = vpop.f32.mrf.mxu1 }
 0x632   :  { %v946_v45 = vsel %vm230_vm3, %v2423_v46, -inf  ;;  %v958_v51 = vsel %vm451_vm6, %v2429_v47, -inf }
 0x633   :  { %v925_v49 = vpop.f32.mrf.mxu1  ;;  %947 = vmax.xlane.f32.xlu0 %v946_v45  ;;  %v873_v50 = vpop.f32.mrf.mxu0 }
 0x634   :  { %v940_v55 = vsel %vm230_vm3, %v873_v50, -inf  ;;  %v952_v62 = vsel %vm451_vm6, %v925_v49, -inf }
 0x635   :  { %v2424_v42 = vpop.f32.mrf.mxu0  ;;  %v2430_v54 = vpop.f32.mrf.mxu1 }
 0x636   :  { %v949_v53 = vsel %vm230_vm3, %v2424_v42, -inf  ;;  %v961_v58 = vsel %vm451_vm6, %v2430_v54, -inf }
 0x637   :  { %959 = vmax.xlane.f32.xlu0 %v958_v51  ;;  %950 = vmax.xlane.f32.xlu1 %v949_v53  ;;  %v876_v59 = vpop.f32.mrf.mxu0  ;;  %v928_v3 = vpop.f32.mrf.mxu1 }
 0x638   :  { %v943_v63 = vsel %vm230_vm3, %v876_v59, -inf  ;;  %v955_v4 = vsel %vm451_vm6, %v928_v3, -inf }
 0x63b   :  { %941 = vmax.xlane.f32.xlu0 %v940_v55  ;;  %962 = vmax.xlane.f32.xlu1 %v961_v58 }
 0x63f   :  { %953 = vmax.xlane.f32.xlu0 %v952_v62  ;;  %944 = vmax.xlane.f32.xlu1 %v943_v63 }
 0x643   :  { %956 = vmax.xlane.f32.xlu1 %v955_v4 }
 0x6bc   :  { %v948_v9 = vpop.xlane.xlu0 %947 }
 0x6c0   :  { %v960_v14 = vpop.xlane.xlu0 %959  ;;  %v951_v7 = vpop.xlane.xlu1 %950 }
 0x6c1   :  { %v966_v18 = vmax.f32 %v948_v9, %v960_v14 }
 0x6c3   :  { %v970_v19 = vsub.f32 %v2423_v46, %v966_v18  ;;  %v982_v8 = vsub.f32 %v2429_v47, %v966_v18 }
 0x6c4   :  { %v942_v17 = vpop.xlane.xlu0 %941  ;;  %v963_v23 = vpop.xlane.xlu1 %962 }
 0x6c5   :  { %v976_v24 = vmul.f32 1.442695, %v970_v19  ;;  %v988_v25 = vmul.f32 1.442695, %v982_v8  ;;  %v967_v15 = vmax.f32 %v951_v7, %v963_v23 }
 0x6c7   :  { %2631 = vpow2.f32 %v976_v24  ;;  %v971_v60 = vsub.f32 %v2424_v42, %v967_v15  ;;  %v983_v30 = vsub.f32 %v2430_v54, %v967_v15 }
 0x6c8   :  { %v954_v34 = vpop.xlane.xlu0 %953  ;;  %v945_v39 = vpop.xlane.xlu1 %944  ;;  %2633 = vpow2.f32 %v988_v25 }
 0x6c9   :  { %v978_v0 = vmul.f32 1.442695, %v971_v60  ;;  %v990_v57 = vmul.f32 1.442695, %v983_v30  ;;  %v964_v40 = vmax.f32 %v942_v17, %v954_v34 }
 0x6cb   :  { %2635 = vpow2.f32 %v978_v0  ;;  %v968_v32 = vsub.f32 %v873_v50, %v964_v40  ;;  %v980_v38 = vsub.f32 %v925_v49, %v964_v40 }
 0x6cc   :  { %v957_v44 = vpop.xlane.xlu1 %956  ;;  %2637 = vpow2.f32 %v990_v57 }
 0x6cd   :  { %v972_v46 = vmul.f32 1.442695, %v968_v32  ;;  %v984_v47 = vmul.f32 1.442695, %v980_v38  ;;  %v965_v45 = vmax.f32 %v945_v39, %v957_v44 }
 0x6cf   :  { %2639 = vpow2.f32 %v972_v46  ;;  %v969_v51 = vsub.f32 %v876_v59, %v965_v45  ;;  %v981_v53 = vsub.f32 %v928_v3, %v965_v45 }
 0x6d0   :  { %2641 = vpow2.f32 %v984_v47 }
 0x6d1   :  { %v974_v42 = vmul.f32 1.442695, %v969_v51  ;;  %v986_v54 = vmul.f32 1.442695, %v981_v53 }
 0x6d3   :  { %2643 = vpow2.f32 %v974_v42 }
 0x6d4   :  { %v2632_v55 = vpop.eup %2631  ;;  %2645 = vpow2.f32 %v986_v54 }
 0x6d5   :  { %v998_v58 = vsel %vm230_vm3, %v2632_v55, 0.0  ;;  %v2634_v62 = vpop.eup %2633 }
 0x6d6   :  { %999 = vadd.xlane.f32.xlu0 %v998_v58  ;;  %v1010_v49 = vsel %vm451_vm6, %v2634_v62, 0.0 }
 0x6d8   :  { %v2636_v50 = vpop.eup %2635 }
 0x6d9   :  { %v1001_v63 = vsel %vm230_vm3, %v2636_v50, 0.0  ;;  %v2638_v4 = vpop.eup %2637 }
 0x6da   :  { %1011 = vadd.xlane.f32.xlu0 %v1010_v49  ;;  %1002 = vadd.xlane.f32.xlu1 %v1001_v63  ;;  %v1013_v9 = vsel %vm451_vm6, %v2638_v4, 0.0 }
 0x6dc   :  { %v2640_v59 = vpop.eup %2639 }
 0x6dd   :  { %v992_v3 = vsel %vm230_vm3, %v2640_v59, 0.0  ;;  %v2642_v14 = vpop.eup %2641 }
 0x6de   :  { %993 = vadd.xlane.f32.xlu0 %v992_v3  ;;  %1014 = vadd.xlane.f32.xlu1 %v1013_v9  ;;  %v1004_v18 = vsel %vm451_vm6, %v2642_v14, 0.0 }
 0x6e0   :  { %v2644_v7 = vpop.eup %2643 }
 0x6e1   :  { %v995_v19 = vsel %vm230_vm3, %v2644_v7, 0.0  ;;  %v2646_v8 = vpop.eup %2645 }
 0x6e2   :  { %1005 = vadd.xlane.f32.xlu0 %v1004_v18  ;;  %996 = vadd.xlane.f32.xlu1 %v995_v19  ;;  %v1007_v17 = vsel %vm451_vm6, %v2646_v8, 0.0 }
 0x6e6   :  { %1008 = vadd.xlane.f32.xlu1 %v1007_v17 }
 0x75f   :  { %v1000_v23 = vpop.xlane.xlu0 %999 }
 0x763   :  { %v1012_v24 = vpop.xlane.xlu0 %1011  ;;  %v1003_v25 = vpop.xlane.xlu1 %1002 }
 0x764   :  { %v1018_v15 = vadd.f32 %v1012_v24, %v1000_v23 }
 0x766   :  { %2647 = vrcp.f32 %v1018_v15 }
 0x767   :  { %v994_v60 = vpop.xlane.xlu0 %993  ;;  %v1015_v30 = vpop.xlane.xlu1 %1014 }
 0x768   :  { %v1019_v34 = vadd.f32 %v1015_v30, %v1003_v25 }
 0x76a   :  { %2649 = vrcp.f32 %v1019_v34 }
 0x76b   :  { %v1006_v39 = vpop.xlane.xlu0 %1005  ;;  %v997_v0 = vpop.xlane.xlu1 %996 }
 0x76c   :  { %v1016_v57 = vadd.f32 %v1006_v39, %v994_v60 }
 0x76e   :  { %2651 = vrcp.f32 %v1016_v57 }
 0x76f   :  { %v1009_v40 = vpop.xlane.xlu1 %1008 }
 0x770   :  { %v1017_v32 = vadd.f32 %v1009_v40, %v997_v0 }
 0x772   :  { %2653 = vrcp.f32 %v1017_v32 }
 0x773   :  { %v2648_v38 = vpop.eup %2647 }
 0x774   :  { %v1026_v46 = vmul.f32 %v2648_v38, %v2632_v55  ;;  %v1030_v45 = vmul.f32 %v2648_v38, %v2634_v62  ;;  %v193_v55 = vld [vmem:[%s3377_s7] sm:$0x3] }
 0x775   :  { %v3159_v18 = vand.u32 %v3045_v35, %v193_v55  ;;  %v1214_v35 = vpack.c.bf16 %v2866_v13, %v2872_v20 }
 0x777   :  { %v2650_v44 = vpop.eup %2649 }
 0x778   :  { %v1027_v47 = vmul.f32 %v2650_v44, %v2636_v50  ;;  %v1031_v51 = vmul.f32 %v2650_v44, %v2638_v4  ;;  %v3156_v4 = vld [vmem:[%s3380_s10] sm:$0xf] }
 0x77a   :  { %v1033_v53 = vpack.c.bf16 %v1027_v47, %v1026_v46  ;;  %v1079_v42 = vpack.c.bf16 %v1031_v51, %v1030_v45 }
 0x77b   :  { %v2652_v54 = vpop.eup %2651 }
 0x77c   :  { %2432 = vmatpush3.bf16.msra.mxu0 %v1033_v53  ;;  %2440 = vmatpush3.bf16.msra.mxu1 %v1079_v42  ;;  %v1024_v49 = vmul.f32 %v2652_v54, %v2640_v59  ;;  %v1028_v3 = vmul.f32 %v2652_v54, %v2642_v14  ;;  %v1170_v59 = vsel %vm240_vm2, %v2833_v6, 0  ;;  %v3178_v14 = vrot.slane %v1214_v35, 1 }
 0x77d   :  { %2433 = vmatprep.subr.bf16.mxu0 %v2731_v5  ;;  %2441 = vmatprep.subr.bf16.mxu1 %v2731_v5 }
 0x77e   :  { %v1218_v15 = vsel %vm240_vm2, %v3178_v14, 0 }
 0x77f   :  { %v2654_v58 = vpop.eup %2653 }
 0x780   :  { %v1025_v63 = vmul.f32 %v2654_v58, %v2644_v7  ;;  %v1029_v9 = vmul.f32 %v2654_v58, %v2646_v8  ;;  %v3182_v7 = vpack.c.bf16 %v2874_v21, %v2874_v21 }
 0x782   :  { %v1032_v62 = vpack.c.bf16 %v1025_v63, %v1024_v49  ;;  %v1078_v50 = vpack.c.bf16 %v1029_v9, %v1028_v3  ;;  %v1294_v13 = vsel %vm75_vm0, %v3182_v7, 0 }
 0x784   :  { %2434 = vmatpush3.bf16.msra.mxu0 %v1032_v62  ;;  %2442 = vmatpush3.bf16.msra.mxu1 %v1078_v50 }
 0x785   :  { %2447 = vmatprep.subr.bf16.mxu0 %v2731_v5  ;;  %2453 = vmatprep.subr.bf16.mxu1 %v2731_v5 }
 0x787   :  { %2436 = vmatmul.mubr.msk.bf16.vlgmr.msra.gmra.mxu0 %vm75_vm0, %v3156_v4  ;;  %2444 = vmatmul.mubr.msk.bf16.vlgmr.msra.gmra.mxu1 %vm75_vm0, %v3156_v4 }
 0x788   :  { %2448 = vmatpush3.bf16.msra.mxu0 %v3159_v18  ;;  %2454 = vmatpush3.bf16.msra.mxu1 %v1170_v59 }
 0x789   :  { %2449 = vmatprep.mubr.msk.bf16.mxu0 %vm2732_vm1, %v2731_v5  ;;  %2455 = vmatprep.mubr.msk.bf16.mxu1 %vm2732_vm1, %v2731_v5 }
 0x78a   :  { %2459 = vmatprep.subr.bf16.mxu0 %v2731_v5  ;;  %2473 = vmatprep.subr.bf16.mxu1 %v2731_v5 }
 0x847   :  { %v1071_v19 = vpop.f32.mrf.mxu0  ;;  %v1114_v8 = vpop.f32.mrf.mxu1 }
 0x848   :  { %v1077_v17 = vpack.c.bf16 %v1071_v19, %v1071_v19  ;;  %v1120_v23 = vpack.c.bf16 %v1114_v8, %v1114_v8 }
 0x849   :  { %v2445_v24 = vpop.f32.mrf.mxu1  ;;  %v2437_v25 = vpop.f32.mrf.mxu0 }
 0x84a   :  { %2450 = vmatmul.mubr.msk.bf16.vlgmr.msra.gmra.mxu0 %vm451_vm6, %v1120_v23  ;;  %2456 = vmatmul.mubr.msk.bf16.vlgmr.msra.gmra.mxu1 %vm230_vm3, %v1077_v17 }
 0x84b   :  { %2460 = vmatpush3.bf16.msra.mxu0 %v1218_v15  ;;  %2474 = vmatpush3.bf16.xpose.msra.mxu1 %v1294_v13  ;;  %v1117_v20 = vpop.f32.mrf.mxu1  ;;  %v1074_v21 = vpop.f32.mrf.mxu0 }
 0x84c   :  { %2461 = vmatprep.mubr.msk.bf16.mxu0 %vm2732_vm1, %v2731_v5  ;;  %2487 = vmatprep.subr.bf16.mxu0 %v2731_v5 }
 0x84d   :  { %v2446_v60 = vpop.f32.mrf.mxu1  ;;  %v2438_v30 = vpop.f32.mrf.mxu0  ;;  %2475 = vmatprep.mubr.msk.bf16.mxu1 %vm2732_vm1, %v2731_v5  ;;  %2501 = vmatprep.subr.bf16.mxu1 %v2731_v5 }
 0x852   :  { %2462 = vmatmul.mubr.msk.bf16.vlgmr.msra.gmra.mxu0 %vm230_vm3, %v2888_v26 }
 0x853   :  { %2465 = vmatprep.mubr.msk.bf16.mxu0 %vm2732_vm1, %v2731_v5  ;;  %2488 = vmatpush3.bf16.xpose.msra.mxu0 %v2892_v27 }
 0x854   :  { %2521 = vmatprep.subr.bf16.mxu0 %v2731_v5 }
 0x85a   :  { %2466 = vmatmul.mubr.msk.bf16.gmra.mxu0 %vm230_vm3, %v2903_v28 }
 0x85b   :  { %2469 = vmatprep.mubr.msk.bf16.mxu0 %vm2732_vm1, %v2731_v5 }
 0x862   :  { %2470 = vmatmul.mubr.msk.bf16.gmra.mxu0 %vm230_vm3, %v2912_v29 }
 0x863   :  { %2489 = vmatprep.mubr.msk.bf16.mxu0 %vm2732_vm1, %v2731_v5 }
 0x90a   :  { %v1161_v26 = vpop.f32.mrf.mxu0  ;;  %v1206_v34 = vpop.f32.mrf.mxu1 }
 0x90b   :  { %v1207_v39 = vadd.f32 %v1206_v34, %v1161_v26 }
 0x90c   :  { %v2451_v0 = vpop.f32.mrf.mxu0  ;;  %v2457_v57 = vpop.f32.mrf.mxu1 }
 0x90d   :  { %1212 = vst.msk [vmem:[#allocation2] sm:$0xff] %vm75_vm0, %v1207_v39 }
 0x90e   :  { %v1164_v27 = vpop.f32.mrf.mxu0  ;;  %v1209_v40 = vpop.f32.mrf.mxu1 }
 0x910   :  { %v2452_v32 = vpop.f32.mrf.mxu0  ;;  %v2458_v28 = vpop.f32.mrf.mxu1 }
 0x912   :  { %v1254_v38 = vpop.f32.mrf.mxu0 }
 0x913   :  { %v1276_v47 = vmul.f32 %v1254_v38, %v2921_v31 }
 0x914   :  { %v2463_v44 = vpop.f32.mrf.mxu0 }
 0x916   :  { %v1257_v46 = vpop.f32.mrf.mxu0 }
 0x917   :  { %v1277_v29 = vmul.f32 %v1257_v46, %v2926_v33 }
 0x918   :  { %v2464_v45 = vpop.f32.mrf.mxu0 }
 0x919   :  { %v1281_v51 = vpack.c.bf16 %v1277_v29, %v1276_v47 }
 0x91a   :  { %v1262_v53 = vpop.f32.mrf.mxu0 }
 0x91b   :  { %2476 = vmatmul.mubr.msk.bf16.vlgmr.msra.gmra.mxu1 %vm75_vm0, %v1281_v51  ;;  %2490 = vmatmul.mubr.msk.bf16.vlgmr.msra.gmra.mxu0 %vm75_vm0, %v1281_v51  ;;  %v1278_v33 = vmul.f32 %v1262_v53, %v2937_v41 }
 0x91c   :  { %2522 = vmatpush3.bf16.msra.mxu0 %v3048_v52  ;;  %v2467_v42 = vpop.f32.mrf.mxu0  ;;  %2479 = vmatprep.mubr.msk.bf16.mxu1 %vm2732_vm1, %v2731_v5 }
 0x91d   :  { %2582 = vmatprep.subr.msk.bf16.mxu0 %vm564_vm4, %v3182_v7  ;;  %2493 = vmatprep.mubr.msk.bf16.mxu0 %vm2732_vm1, %v2731_v5 }
 0x91e   :  { %v1265_v31 = vpop.f32.mrf.mxu0 }
 0x91f   :  { %v1279_v54 = vmul.f32 %v1265_v31, %v2942_v43 }
 0x920   :  { %v2468_v58 = vpop.f32.mrf.mxu0 }
 0x921   :  { %v1282_v49 = vpack.c.bf16 %v1279_v54, %v1278_v33 }
 0x922   :  { %v1270_v63 = vpop.f32.mrf.mxu0 }
 0x923   :  { %v1280_v52 = vmul.f32 %v1270_v63, %v2955_v48  ;;  %2480 = vmatmul.mubr.msk.bf16.gmra.mxu1 %vm75_vm0, %v1282_v49  ;;  %2494 = vmatmul.mubr.msk.bf16.gmra.mxu0 %vm75_vm0, %v1282_v49 }
 0x924   :  { %v2471_v3 = vpop.f32.mrf.mxu0  ;;  %2483 = vmatprep.mubr.msk.bf16.mxu1 %vm2732_vm1, %v2731_v5  ;;  %2497 = vmatprep.mubr.msk.bf16.mxu0 %vm2732_vm1, %v2731_v5 }
 0x925   :  { %v1283_v41 = vpack.c.bf16 %v1280_v52, %v1280_v52 }
 0x926   :  { %v1273_v9 = vpop.f32.mrf.mxu0 }
 0x928   :  { %v2472_v55 = vpop.f32.mrf.mxu0 }
 0x92b   :  { %2484 = vmatmul.mubr.msk.bf16.gmra.mxu1 %vm75_vm0, %v1283_v41  ;;  %2498 = vmatmul.mubr.msk.bf16.gmra.mxu0 %vm75_vm0, %v1283_v41 }
 0x92c   :  { %2507 = vmatprep.mubr.msk.bf16.mxu1 %vm2732_vm1, %v2731_v5  ;;  %2523 = vmatprep.mubr.msk.bf16.mxu0 %vm2732_vm1, %v2731_v5 }
 0x9db   :  { %v3237_v43 = vpop.f32.mrf.mxu1  ;;  %v3239_v48 = vpop.f32.mrf.mxu0 }
 0x9dc   :  { %v1408_v47 = vsel %vm435_vm5, %v3237_v43, -inf  ;;  %v1423_v45 = vsel %vm451_vm6, %v3239_v48, -inf }
 0x9dd   :  { %v2477_v62 = vpop.f32.mrf.mxu1  ;;  %v2491_v50 = vpop.f32.mrf.mxu0 }
 0x9df   :  { %v3241_v59 = vpop.f32.mrf.mxu1  ;;  %v3243_v35 = vpop.f32.mrf.mxu0 }
 0x9e0   :  { %v1411_v29 = vsel %vm435_vm5, %v3241_v59, -inf  ;;  %v1426_v51 = vsel %vm451_vm6, %v3243_v35, -inf }
 0x9e1   :  { %v2478_v19 = vpop.f32.mrf.mxu1  ;;  %v2492_v8 = vpop.f32.mrf.mxu0 }
 0x9e3   :  { %v1338_v17 = vpop.f32.mrf.mxu1  ;;  %v1394_v23 = vpop.f32.mrf.mxu0 }
 0x9e4   :  { %v1414_v24 = vsel %vm435_vm5, %v1338_v17, -inf  ;;  %v1429_v28 = vsel %vm451_vm6, %v1394_v23, -inf }
 0x9e5   :  { %1415 = vmax.xlane.f32.xlu0 %v1414_v24  ;;  %v2481_v25 = vpop.f32.mrf.mxu1  ;;  %v2495_v15 = vpop.f32.mrf.mxu0 }
 0x9e7   :  { %v1341_v13 = vpop.f32.mrf.mxu1  ;;  %v1397_v20 = vpop.f32.mrf.mxu0 }
 0x9e8   :  { %v1417_v21 = vsel %vm435_vm5, %v1341_v13, -inf  ;;  %v1432_v38 = vsel %vm451_vm6, %v1397_v20, -inf }
 0x9e9   :  { %1418 = vmax.xlane.f32.xlu1 %v1417_v21  ;;  %v2482_v60 = vpop.f32.mrf.mxu1  ;;  %v2496_v30 = vpop.f32.mrf.mxu0 }
 0x9eb   :  { %v1346_v26 = vpop.f32.mrf.mxu1  ;;  %v1402_v34 = vpop.f32.mrf.mxu0 }
 0x9ec   :  { %v1420_v39 = vsel %vm435_vm5, %v1346_v26, -inf  ;;  %v1435_v0 = vsel %vm451_vm6, %v1402_v34, -inf }
 0x9ed   :  { %1421 = vmax.xlane.f32.xlu0 %v1420_v39  ;;  %v2485_v57 = vpop.f32.mrf.mxu1  ;;  %1436 = vmax.xlane.f32.xlu1 %v1435_v0  ;;  %v2499_v27 = vpop.f32.mrf.mxu0 }
 0x9ef   :  { %v1349_v40 = vpop.f32.mrf.mxu1  ;;  %v1405_v32 = vpop.f32.mrf.mxu0 }
 0x9f1   :  { %v2486_v44 = vpop.f32.mrf.mxu1  ;;  %1430 = vmax.xlane.f32.xlu0 %v1429_v28  ;;  %1433 = vmax.xlane.f32.xlu1 %v1432_v38  ;;  %v2500_v46 = vpop.f32.mrf.mxu0 }
 0x9f5   :  { %1409 = vmax.xlane.f32.xlu0 %v1408_v47  ;;  %1412 = vmax.xlane.f32.xlu1 %v1411_v29 }
 0x9f9   :  { %1424 = vmax.xlane.f32.xlu0 %v1423_v45  ;;  %1427 = vmax.xlane.f32.xlu1 %v1426_v51 }
 0xa6e   :  { %v1416_v53 = vpop.xlane.xlu0 %1415 }
 0xa72   :  { %v1419_v42 = vpop.xlane.xlu1 %1418 }
 0xa76   :  { %v1422_v31 = vpop.xlane.xlu0 %1421  ;;  %v1437_v33 = vpop.xlane.xlu1 %1436 }
 0xa77   :  { %v1442_v54 = vmax.f32 %v1422_v31, %v1437_v33 }
 0xa79   :  { %v1447_v58 = vsub.f32 %v1346_v26, %v1442_v54  ;;  %v1462_v9 = vsub.f32 %v1402_v34, %v1442_v54 }
 0xa7a   :  { %v1431_v49 = vpop.xlane.xlu0 %1430  ;;  %v1434_v63 = vpop.xlane.xlu1 %1433 }
 0xa7b   :  { %v1440_v52 = vmax.f32 %v1416_v53, %v1431_v49  ;;  %v1441_v3 = vmax.f32 %v1419_v42, %v1434_v63  ;;  %v1456_v62 = vmul.f32 1.442695, %v1447_v58  ;;  %v1471_v15 = vmul.f32 1.442695, %v1462_v9 }
 0xa7d   :  { %v1445_v41 = vsub.f32 %v1338_v17, %v1440_v52  ;;  %v1446_v55 = vsub.f32 %v1341_v13, %v1441_v3  ;;  %v1460_v24 = vsub.f32 %v1394_v23, %v1440_v52  ;;  %v1461_v21 = vsub.f32 %v1397_v20, %v1441_v3 }
 0xa7e   :  { %v1410_v50 = vpop.xlane.xlu0 %1409  ;;  %v1413_v19 = vpop.xlane.xlu1 %1412 }
 0xa7f   :  { %v1452_v8 = vmul.f32 1.442695, %v1445_v41  ;;  %v1454_v25 = vmul.f32 1.442695, %v1446_v55  ;;  %v1467_v26 = vmul.f32 1.442695, %v1460_v24 }
 0xa80   :  { %v1469_v34 = vmul.f32 1.442695, %v1461_v21 }
 0xa81   :  { %2655 = vpow2.f32 %v1452_v8 }
 0xa82   :  { %2657 = vpow2.f32 %v1456_v62  ;;  %v1425_v60 = vpop.xlane.xlu0 %1424  ;;  %v1428_v30 = vpop.xlane.xlu1 %1427 }
 0xa83   :  { %2659 = vpow2.f32 %v1454_v25  ;;  %v1438_v39 = vmax.f32 %v1410_v50, %v1425_v60  ;;  %v1439_v0 = vmax.f32 %v1413_v19, %v1428_v30 }
 0xa84   :  { %2661 = vpow2.f32 %v1471_v15 }
 0xa85   :  { %v1443_v17 = vsub.f32 %v3237_v43, %v1438_v39  ;;  %v1444_v13 = vsub.f32 %v3241_v59, %v1439_v0  ;;  %2663 = vpow2.f32 %v1467_v26  ;;  %v1458_v23 = vsub.f32 %v3239_v48, %v1438_v39 }
 0xa86   :  { %2665 = vpow2.f32 %v1469_v34  ;;  %v1459_v20 = vsub.f32 %v3243_v35, %v1439_v0 }
 0xa87   :  { %v1448_v57 = vmul.f32 1.442695, %v1443_v17  ;;  %v1450_v27 = vmul.f32 1.442695, %v1444_v13  ;;  %v1463_v40 = vmul.f32 1.442695, %v1458_v23 }
 0xa88   :  { %v1465_v32 = vmul.f32 1.442695, %v1459_v20 }
 0xa89   :  { %2667 = vpow2.f32 %v1448_v57 }
 0xa8a   :  { %2669 = vpow2.f32 %v1450_v27 }
 0xa8b   :  { %2671 = vpow2.f32 %v1463_v40 }
 0xa8c   :  { %2673 = vpow2.f32 %v1465_v32 }
 0xa8e   :  { %v2656_v28 = vpop.eup %2655 }
 0xa8f   :  { %v2658_v38 = vpop.eup %2657  ;;  %v1479_v44 = vsel %vm435_vm5, %v2656_v28, 0.0 }
 0xa90   :  { %v2660_v43 = vpop.eup %2659  ;;  %1480 = vadd.xlane.f32.xlu0 %v1479_v44  ;;  %v1485_v48 = vsel %vm435_vm5, %v2658_v38, 0.0 }
 0xa91   :  { %v1482_v59 = vsel %vm435_vm5, %v2660_v43, 0.0  ;;  %v2662_v46 = vpop.eup %2661 }
 0xa92   :  { %1483 = vadd.xlane.f32.xlu1 %v1482_v59  ;;  %v3266_v47 = vpop.eup %2663  ;;  %v1500_v35 = vsel %vm451_vm6, %v2662_v46, 0.0 }
 0xa93   :  { %v2666_v29 = vpop.eup %2665  ;;  %v1494_v45 = vsel %vm451_vm6, %v3266_v47, 0.0 }
 0xa94   :  { %1486 = vadd.xlane.f32.xlu0 %v1485_v48  ;;  %v1497_v53 = vsel %vm451_vm6, %v2666_v29, 0.0 }
 0xa96   :  { %1501 = vadd.xlane.f32.xlu1 %v1500_v35  ;;  %v2668_v51 = vpop.eup %2667 }
 0xa97   :  { %v2670_v42 = vpop.eup %2669  ;;  %v1473_v31 = vsel %vm435_vm5, %v2668_v51, 0.0 }
 0xa98   :  { %1495 = vadd.xlane.f32.xlu0 %v1494_v45  ;;  %v2672_v33 = vpop.eup %2671  ;;  %v1476_v54 = vsel %vm435_vm5, %v2670_v42, 0.0 }
 0xa99   :  { %v2674_v58 = vpop.eup %2673  ;;  %v1488_v49 = vsel %vm451_vm6, %v2672_v33, 0.0 }
 0xa9a   :  { %1498 = vadd.xlane.f32.xlu1 %v1497_v53  ;;  %v1491_v63 = vsel %vm451_vm6, %v2674_v58, 0.0 }
 0xa9c   :  { %1474 = vadd.xlane.f32.xlu0 %v1473_v31 }
 0xa9e   :  { %1477 = vadd.xlane.f32.xlu1 %v1476_v54 }
 0xaa0   :  { %1489 = vadd.xlane.f32.xlu0 %v1488_v49 }
 0xaa2   :  { %1492 = vadd.xlane.f32.xlu1 %v1491_v63 }
 0xb19   :  { %v1481_v52 = vpop.xlane.xlu0 %1480 }
 0xb1b   :  { %v1484_v3 = vpop.xlane.xlu1 %1483 }
 0xb1d   :  { %v1487_v9 = vpop.xlane.xlu0 %1486 }
 0xb1f   :  { %v1502_v41 = vpop.xlane.xlu1 %1501 }
 0xb20   :  { %v1507_v55 = vadd.f32 %v1502_v41, %v1487_v9  ;;  %v1714_v9 = vsel %vm564_vm4, %v3182_v7, 0 }
 0xb21   :  { %v1496_v62 = vpop.xlane.xlu0 %1495 }
 0xb22   :  { %2675 = vrcp.f32 %v1507_v55  ;;  %v1505_v50 = vadd.f32 %v1496_v62, %v1481_v52 }
 0xb23   :  { %v1499_v19 = vpop.xlane.xlu1 %1498 }
 0xb24   :  { %2677 = vrcp.f32 %v1505_v50  ;;  %v1506_v8 = vadd.f32 %v1499_v19, %v1484_v3 }
 0xb25   :  { %v1475_v24 = vpop.xlane.xlu0 %1474 }
 0xb26   :  { %2679 = vrcp.f32 %v1506_v8 }
 0xb27   :  { %v1478_v25 = vpop.xlane.xlu1 %1477 }
 0xb29   :  { %v1490_v15 = vpop.xlane.xlu0 %1489 }
 0xb2a   :  { %v1503_v21 = vadd.f32 %v1490_v15, %v1475_v24 }
 0xb2b   :  { %v1493_v60 = vpop.xlane.xlu1 %1492 }
 0xb2c   :  { %2681 = vrcp.f32 %v1503_v21  ;;  %v1504_v30 = vadd.f32 %v1493_v60, %v1478_v25 }
 0xb2e   :  { %2683 = vrcp.f32 %v1504_v30 }
 0xb2f   :  { %v2676_v26 = vpop.eup %2675 }
 0xb30   :  { %v1517_v39 = vmul.f32 %v2676_v26, %v2658_v38  ;;  %v1522_v44 = vmul.f32 %v2676_v26, %v2662_v46 }
 0xb31   :  { %v2678_v0 = vpop.eup %2677 }
 0xb32   :  { %v1525_v34 = vpack.c.bf16 %v1517_v39, %v1517_v39  ;;  %v1515_v17 = vmul.f32 %v2678_v0, %v2656_v28  ;;  %v1573_v48 = vpack.c.bf16 %v1522_v44, %v1522_v44  ;;  %v1520_v28 = vmul.f32 %v2678_v0, %v3266_v47 }
 0xb33   :  { %v2680_v13 = vpop.eup %2679  ;;  %v1664_v47 = vrot.slane %v2854_v12, 4 }
 0xb34   :  { %v1527_v57 = vsel %vm564_vm4, %v1525_v34, 0  ;;  %v1516_v23 = vmul.f32 %v2680_v13, %v2660_v43  ;;  %v1521_v43 = vmul.f32 %v2680_v13, %v2666_v29  ;;  %v1575_v35 = vsel %vm564_vm4, %v1573_v48, 0 }
 0xb35   :  { %2502 = vmatpush3.bf16.msra.mxu1 %v1527_v57  ;;  %v1669_v53 = vsel %vm564_vm4, %v1664_v47, 0 }
 0xb36   :  { %2503 = vmatprep.subr.bf16.mxu1 %v2731_v5  ;;  %v1524_v27 = vpack.c.bf16 %v1516_v23, %v1515_v17  ;;  %v1572_v46 = vpack.c.bf16 %v1521_v43, %v1520_v28 }
 0xb39   :  { %v2682_v20 = vpop.eup %2681  ;;  %2504 = vmatpush3.bf16.msra.mxu1 %v1524_v27 }
 0xb3a   :  { %2505 = vmatprep.subr.bf16.mxu1 %v2731_v5  ;;  %v1513_v40 = vmul.f32 %v2682_v20, %v2668_v51  ;;  %v1518_v45 = vmul.f32 %v2682_v20, %v2672_v33 }
 0xb3b   :  { %v2684_v32 = vpop.eup %2683 }
 0xb3c   :  { %v1514_v59 = vmul.f32 %v2684_v32, %v2670_v42  ;;  %v1519_v51 = vmul.f32 %v2684_v32, %v2674_v58  ;;  %v1777_v58 = vsel %vm75_vm0, %v3178_v14, 0 }
 0xb3e   :  { %v1523_v38 = vpack.c.bf16 %v1514_v59, %v1513_v40  ;;  %v1571_v29 = vpack.c.bf16 %v1519_v51, %v1518_v45 }
 0xb40   :  { %2506 = vmatpush3.bf16.msra.mxu1 %v1523_v38 }
 0xb41   :  { %2511 = vmatprep.subr.bf16.mxu1 %v2731_v5 }
 0xb43   :  { %2508 = vmatmul.mubr.msk.bf16.vlgmr.msra.gmra.mxu1 %vm560_vm7, %v3030_v36 }
 0xb44   :  { %2512 = vmatpush3.bf16.msra.mxu1 %v1575_v35  ;;  %2517 = vmatprep.mubr.msk.bf16.mxu1 %vm2732_vm1, %v2731_v5 }
 0xb45   :  { %2513 = vmatprep.subr.bf16.mxu1 %v2731_v5 }
 0xb48   :  { %2514 = vmatpush3.bf16.msra.mxu1 %v1572_v46 }
 0xb49   :  { %2515 = vmatprep.subr.bf16.mxu1 %v2731_v5 }
 0xb4c   :  { %2516 = vmatpush3.bf16.msra.mxu1 %v1571_v29 }
 0xb4d   :  { %2527 = vmatprep.subr.bf16.mxu1 %v2731_v5 }
 0xb4f   :  { %2518 = vmatmul.mubr.msk.bf16.vlgmr.msra.gmra.mxu1 %vm560_vm7, %v3030_v36 }
 0xb50   :  { %2528 = vmatpush3.bf16.msra.mxu1 %v1669_v53  ;;  %2529 = vmatprep.mubr.msk.bf16.mxu1 %vm2732_vm1, %v2731_v5 }
 0xb51   :  { %2583 = vmatprep.subr.msk.bf16.mxu1 %vm75_vm0, %v3178_v14 }
 0xc03   :  { %v1563_v42 = vpop.f32.mrf.mxu1 }
 0xc05   :  { %v2509_v31 = vpop.f32.mrf.mxu1 }
 0xc07   :  { %v1566_v33 = vpop.f32.mrf.mxu1 }
 0xc08   :  { %v1570_v12 = vpack.c.bf16 %v1566_v33, %v1563_v42 }
 0xc09   :  { %v2510_v54 = vpop.f32.mrf.mxu1 }
 0xc0a   :  { %2530 = vmatmul.mubr.msk.bf16.vlgmr.msra.gmra.mxu1 %vm435_vm5, %v1570_v12 }
 0xc0b   :  { %2540 = vmatpush3.bf16.xpose.msra.mxu1 %v1777_v58 }
 0xc0c   :  { %2551 = vmatprep.subr.bf16.mxu1 %v2731_v5 }
 0xc0f   :  { %v1611_v36 = vpop.f32.mrf.mxu1 }
 0xc11   :  { %v2519_v49 = vpop.f32.mrf.mxu1 }
 0xc13   :  { %v1614_v63 = vpop.f32.mrf.mxu1 }
 0xc14   :  { %v1618_v52 = vpack.c.bf16 %v1614_v63, %v1611_v36 }
 0xc15   :  { %v2520_v3 = vpop.f32.mrf.mxu1 }
 0xc16   :  { %2524 = vmatmul.mubr.msk.bf16.vlgmr.msra.gmra.mxu0 %vm451_vm6, %v1618_v52 }
 0xc17   :  { %2534 = vmatpush3.bf16.msra.mxu0 %v1714_v9  ;;  %2535 = vmatprep.mubr.msk.bf16.mxu0 %vm435_vm5, %v3065_v2 }
 0xc18   :  { %2584 = vmatprep.subr.msk.bf16.mxu0 %vm75_vm0, %v3082_v10 }
 0xc1e   :  { %2536 = vmatmul.mubr.msk.bf16.vlgmr.msra.gmra.mxu0 %vm435_vm5, %v3075_v22 }
 0xc1f   :  { %2546 = vmatpush3.bf16.xpose.msra.mxu0 %v3088_v16 }
 0xc20   :  { %2559 = vmatprep.subr.bf16.mxu0 %v2731_v5 }
 0xcca   :  { %v1705_v14 = vpop.f32.mrf.mxu1 }
 0xccc   :  { %v2531_v41 = vpop.f32.mrf.mxu1 }
 0xcce   :  { %v1708_v55 = vpop.f32.mrf.mxu1 }
 0xcd0   :  { %v2532_v62 = vpop.f32.mrf.mxu1 }
 0xcd6   :  { %v1656_v50 = vpop.f32.mrf.mxu0 }
 0xcd7   :  { %v1706_v7 = vadd.f32 %v1705_v14, %v1656_v50 }
 0xcd8   :  { %v2525_v19 = vpop.f32.mrf.mxu0 }
 0xcd9   :  { %1712 = vst.msk [vmem:[%s3384_s14 + $0xa] sm:$0xff] %vm75_vm0, %v1706_v7 }
 0xcda   :  { %v1659_v2 = vpop.f32.mrf.mxu0 }
 0xcdb   :  { %v1709_v10 = vadd.f32 %v1708_v55, %v1659_v2 }
 0xcdc   :  { %v2526_v8 = vpop.f32.mrf.mxu0 }
 0xcdd   :  { %1713 = vst.msk [vmem:[%s3384_s14 + $0x12] sm:$0x3] %vm756_vm10, %v1709_v10  ;;  %s2734_s14 = smov [#allocation2]  }
 0xcde   :  { %v2537_v22 = vpop.f32.mrf.mxu0  ;;  %s2158_s16 = sshll.u32 %s2734_s14, 4  ;;  %s2159_s16 = int_to_ptr.vmem [resolvable:$true] %s2158_s16 }
 0xcdf   :  { %v1767_v30 = vmul.f32 %v2537_v22, %v3118_v37  ;;  %s2709_s13 = scalar_lea.vmem %s2159_s16, 256  ;;  %p2714_p1 = scmp.lt.s32.totalorder %s2159_s16, %s2159_s16 }
 0xce0   :  { %v1750_v16 = vpop.f32.mrf.mxu0  ;;  %p2710_p0 = scmp.ne.s32.totalorder %s2159_s16, %s2709_s13  ;;  %p2715_p2 = scmp.lt.s32.totalorder %s2709_s13, %s2709_s13 }
 0xce1   :  { %v1765_v21 = vmul.f32 %v1750_v16, %v3108_v1 }
 0xce2   :  { %v2538_v24 = vpop.f32.mrf.mxu0  ;;  %p2716_p3 = por %p2715_p2, %p2714_p1 }
 0xce3   :  { %v1768_v25 = vmul.f32 %v2538_v24, %v3103_v61 }
 0xce4   :  { %v1753_v15 = vpop.f32.mrf.mxu0  ;;  %p2717_p4 = pnand %p2716_p3, %p2710_p0 }
 0xce5   :  { %v1766_v60 = vmul.f32 %v1753_v15, %v3113_v56  ;;  %v1770_v39 = vpack.c.bf16 %v1768_v25, %v1767_v30 }
 0xce7   :  { %v1769_v26 = vpack.c.bf16 %v1766_v60, %v1765_v21 }
 0xce9   :  { %2541 = vmatprep.mubr.msk.bf16.mxu1 %vm75_vm0, %v1769_v26  ;;  %2547 = vmatprep.mubr.msk.bf16.mxu0 %vm75_vm0, %v1769_v26 }
 0xcea   :  { %2542 = vmatmul.mubr.msk.bf16.vlgmr.msra.gmra.mxu1 %vm75_vm0, %v1770_v39  ;;  %2548 = vmatmul.mubr.msk.bf16.vlgmr.msra.gmra.mxu0 %vm75_vm0, %v1770_v39 }
 0xceb   :  { %2555 = vmatprep.mubr.msk.bf16.mxu1 %vm2732_vm1, %v2731_v5  ;;  %2563 = vmatprep.mubr.msk.bf16.mxu0 %vm2732_vm1, %v2731_v5 }
 0xdaa   :  { %v2543_v61 = vpop.f32.mrf.mxu1  ;;  %v2549_v1 = vpop.f32.mrf.mxu0 }
 0xdab   :  { %v1883_v56 = vsel %vm230_vm3, %v2543_v61, -inf  ;;  %v1895_v17 = vsel %vm451_vm6, %v2549_v1, -inf }
 0xdac   :  { %v1862_v37 = vpop.f32.mrf.mxu0  ;;  %1884 = vmax.xlane.f32.xlu0 %v1883_v56  ;;  %v1813_v0 = vpop.f32.mrf.mxu1 }
 0xdad   :  { %v1877_v23 = vsel %vm230_vm3, %v1813_v0, -inf  ;;  %v1889_v40 = vsel %vm451_vm6, %v1862_v37, -inf }
 0xdae   :  { %v2544_v34 = vpop.f32.mrf.mxu1  ;;  %v2550_v57 = vpop.f32.mrf.mxu0 }
 0xdaf   :  { %v1886_v13 = vsel %vm230_vm3, %v2544_v34, -inf  ;;  %v1898_v27 = vsel %vm451_vm6, %v2550_v57, -inf }
 0xdb0   :  { %1896 = vmax.xlane.f32.xlu0 %v1895_v17  ;;  %1887 = vmax.xlane.f32.xlu1 %v1886_v13  ;;  %v1816_v20 = vpop.f32.mrf.mxu1  ;;  %v1865_v44 = vpop.f32.mrf.mxu0 }
 0xdb1   :  { %v1880_v32 = vsel %vm230_vm3, %v1816_v20, -inf  ;;  %v1892_v59 = vsel %vm451_vm6, %v1865_v44, -inf }
 0xdb4   :  { %1878 = vmax.xlane.f32.xlu0 %v1877_v23  ;;  %1899 = vmax.xlane.f32.xlu1 %v1898_v27 }
 0xdb8   :  { %1890 = vmax.xlane.f32.xlu0 %v1889_v40  ;;  %1881 = vmax.xlane.f32.xlu1 %v1880_v32 }
 0xdbc   :  { %1893 = vmax.xlane.f32.xlu1 %v1892_v59 }
 0xe35   :  { %v1885_v38 = vpop.xlane.xlu0 %1884 }
 0xe39   :  { %v1897_v48 = vpop.xlane.xlu0 %1896  ;;  %v1888_v28 = vpop.xlane.xlu1 %1887 }
 0xe3a   :  { %v1903_v43 = vmax.f32 %v1885_v38, %v1897_v48 }
 0xe3c   :  { %v1907_v35 = vsub.f32 %v2543_v61, %v1903_v43  ;;  %v1919_v46 = vsub.f32 %v2549_v1, %v1903_v43 }
 0xe3d   :  { %v1879_v45 = vpop.xlane.xlu0 %1878  ;;  %v1900_v51 = vpop.xlane.xlu1 %1899 }
 0xe3e   :  { %v1913_v47 = vmul.f32 1.442695, %v1907_v35  ;;  %v1925_v29 = vmul.f32 1.442695, %v1919_v46  ;;  %v1904_v53 = vmax.f32 %v1888_v28, %v1900_v51 }
 0xe40   :  { %2685 = vpow2.f32 %v1913_v47  ;;  %v1908_v42 = vsub.f32 %v2544_v34, %v1904_v53  ;;  %v1920_v31 = vsub.f32 %v2550_v57, %v1904_v53 }
 0xe41   :  { %v1891_v33 = vpop.xlane.xlu0 %1890  ;;  %v1882_v12 = vpop.xlane.xlu1 %1881  ;;  %2687 = vpow2.f32 %v1925_v29 }
 0xe42   :  { %v1915_v54 = vmul.f32 1.442695, %v1908_v42  ;;  %v1927_v58 = vmul.f32 1.442695, %v1920_v31  ;;  %v1901_v36 = vmax.f32 %v1879_v45, %v1891_v33  ;;  %v2101_v33 = vrot.slane %v2833_v6, 5 }
 0xe44   :  { %2689 = vpow2.f32 %v1915_v54  ;;  %v1905_v49 = vsub.f32 %v1813_v0, %v1901_v36  ;;  %v1917_v63 = vsub.f32 %v1862_v37, %v1901_v36 }
 0xe45   :  { %v1894_v52 = vpop.xlane.xlu1 %1893  ;;  %2691 = vpow2.f32 %v1927_v58 }
 0xe46   :  { %v1909_v3 = vmul.f32 1.442695, %v1905_v49  ;;  %v1921_v9 = vmul.f32 1.442695, %v1917_v63  ;;  %v1902_v14 = vmax.f32 %v1882_v12, %v1894_v52  ;;  %v2102_v12 = vrot.slane %v2851_v11, 5 }
 0xe48   :  { %2693 = vpow2.f32 %v1909_v3  ;;  %v1906_v41 = vsub.f32 %v1816_v20, %v1902_v14  ;;  %v1918_v55 = vsub.f32 %v1865_v44, %v1902_v14  ;;  %v2103_v54 = vsel %vm2100_vm11, %v2101_v33, %v2102_v12 }
 0xe49   :  { %2695 = vpow2.f32 %v1921_v9  ;;  %v2108_v58 = vsel %vm240_vm2, %v2103_v54, 0 }
 0xe4a   :  { %v1911_v62 = vmul.f32 1.442695, %v1906_v41  ;;  %v1923_v50 = vmul.f32 1.442695, %v1918_v55 }
 0xe4c   :  { %2697 = vpow2.f32 %v1911_v62 }
 0xe4d   :  { %v2686_v7 = vpop.eup %2685  ;;  %2699 = vpow2.f32 %v1923_v50 }
 0xe4e   :  { %v1935_v19 = vsel %vm230_vm3, %v2686_v7, 0.0  ;;  %v2688_v2 = vpop.eup %2687 }
 0xe4f   :  { %1936 = vadd.xlane.f32.xlu0 %v1935_v19  ;;  %v1947_v8 = vsel %vm451_vm6, %v2688_v2, 0.0 }
 0xe51   :  { %v2690_v10 = vpop.eup %2689 }
 0xe52   :  { %v1938_v22 = vsel %vm230_vm3, %v2690_v10, 0.0  ;;  %v2692_v16 = vpop.eup %2691 }
 0xe53   :  { %1948 = vadd.xlane.f32.xlu0 %v1947_v8  ;;  %1939 = vadd.xlane.f32.xlu1 %v1938_v22  ;;  %v1950_v15 = vsel %vm451_vm6, %v2692_v16, 0.0 }
 0xe55   :  { %v2694_v24 = vpop.eup %2693 }
 0xe56   :  { %v1929_v25 = vsel %vm230_vm3, %v2694_v24, 0.0  ;;  %v2696_v21 = vpop.eup %2695 }
 0xe57   :  { %1930 = vadd.xlane.f32.xlu0 %v1929_v25  ;;  %1951 = vadd.xlane.f32.xlu1 %v1950_v15  ;;  %v1941_v30 = vsel %vm451_vm6, %v2696_v21, 0.0 }
 0xe59   :  { %v2698_v60 = vpop.eup %2697 }
 0xe5a   :  { %v1932_v26 = vsel %vm230_vm3, %v2698_v60, 0.0  ;;  %v2700_v39 = vpop.eup %2699 }
 0xe5b   :  { %1942 = vadd.xlane.f32.xlu0 %v1941_v30  ;;  %1933 = vadd.xlane.f32.xlu1 %v1932_v26  ;;  %v1944_v61 = vsel %vm451_vm6, %v2700_v39, 0.0 }
 0xe5f   :  { %1945 = vadd.xlane.f32.xlu1 %v1944_v61 }
 0xed8   :  { %v1937_v1 = vpop.xlane.xlu0 %1936 }
 0xedc   :  { %v1949_v56 = vpop.xlane.xlu0 %1948  ;;  %v1940_v37 = vpop.xlane.xlu1 %1939 }
 0xedd   :  { %v1955_v0 = vadd.f32 %v1949_v56, %v1937_v1 }
 0xedf   :  { %2701 = vrcp.f32 %v1955_v0 }
 0xee0   :  { %v1931_v34 = vpop.xlane.xlu0 %1930  ;;  %v1952_v17 = vpop.xlane.xlu1 %1951 }
 0xee1   :  { %v1956_v13 = vadd.f32 %v1952_v17, %v1940_v37 }
 0xee3   :  { %2703 = vrcp.f32 %v1956_v13 }
 0xee4   :  { %v1943_v57 = vpop.xlane.xlu0 %1942  ;;  %v1934_v23 = vpop.xlane.xlu1 %1933 }
 0xee5   :  { %v1953_v27 = vadd.f32 %v1943_v57, %v1931_v34 }
 0xee7   :  { %2705 = vrcp.f32 %v1953_v27 }
 0xee8   :  { %v1946_v20 = vpop.xlane.xlu1 %1945 }
 0xee9   :  { %v1954_v40 = vadd.f32 %v1946_v20, %v1934_v23 }
 0xeeb   :  { %2707 = vrcp.f32 %v1954_v40 }
 0xeec   :  { %v2702_v32 = vpop.eup %2701 }
 0xeed   :  { %v1963_v59 = vmul.f32 %v2702_v32, %v2686_v7  ;;  %v1967_v48 = vmul.f32 %v2702_v32, %v2688_v2 }
 0xef0   :  { %v2704_v44 = vpop.eup %2703 }
 0xef1   :  { %v1964_v38 = vmul.f32 %v2704_v44, %v2690_v10  ;;  %v1968_v28 = vmul.f32 %v2704_v44, %v2692_v16 }
 0xef3   :  { %v1970_v43 = vpack.c.bf16 %v1964_v38, %v1963_v59  ;;  %v2013_v35 = vpack.c.bf16 %v1968_v28, %v1967_v48 }
 0xef4   :  { %v2706_v46 = vpop.eup %2705 }
 0xef5   :  { %2552 = vmatpush3.bf16.msra.mxu1 %v1970_v43  ;;  %2560 = vmatpush3.bf16.msra.mxu0 %v2013_v35  ;;  %v1961_v51 = vmul.f32 %v2706_v46, %v2694_v24  ;;  %v1965_v29 = vmul.f32 %v2706_v46, %v2696_v21 }
 0xef6   :  { %2553 = vmatprep.subr.bf16.mxu1 %v2731_v5  ;;  %2561 = vmatprep.subr.bf16.mxu0 %v2731_v5 }
 0xef8   :  { %v2708_v45 = vpop.eup %2707 }
 0xef9   :  { %v1962_v47 = vmul.f32 %v2708_v45, %v2698_v60  ;;  %v1966_v53 = vmul.f32 %v2708_v45, %v2700_v39 }
 0xefb   :  { %v1969_v42 = vpack.c.bf16 %v1962_v47, %v1961_v51  ;;  %v2012_v31 = vpack.c.bf16 %v1966_v53, %v1965_v29 }
 0xefd   :  { %2554 = vmatpush3.bf16.msra.mxu1 %v1969_v42  ;;  %2562 = vmatpush3.bf16.msra.mxu0 %v2012_v31 }
 0xefe   :  { %2567 = vmatprep.subr.bf16.mxu1 %v2731_v5  ;;  %2573 = vmatprep.subr.bf16.mxu0 %v2731_v5 }
 0xf00   :  { %2556 = vmatmul.mubr.msk.bf16.vlgmr.msra.gmra.mxu1 %vm75_vm0, %v3156_v4  ;;  %2564 = vmatmul.mubr.msk.bf16.vlgmr.msra.gmra.mxu0 %vm75_vm0, %v3156_v4 }
 0xf01   :  { %2568 = vmatpush3.bf16.msra.mxu1 %v3159_v18  ;;  %2569 = vmatprep.mubr.msk.bf16.mxu1 %vm2732_vm1, %v2731_v5 }
 0xf02   :  { %2575 = vmatprep.mubr.msk.bf16.mxu0 %vm2732_vm1, %v2731_v5  ;;  %2574 = vmatpush3.bf16.msra.mxu0 %v2108_v58 }
 0xfc0   :  { %v2005_v36 = vpop.f32.mrf.mxu1  ;;  %v2048_v49 = vpop.f32.mrf.mxu0 }
 0xfc1   :  { %v2011_v4 = vpack.c.bf16 %v2005_v36, %v2005_v36  ;;  %v2054_v63 = vpack.c.bf16 %v2048_v49, %v2048_v49 }
 0xfc2   :  { %v2557_v18 = vpop.f32.mrf.mxu1  ;;  %v2565_v52 = vpop.f32.mrf.mxu0 }
 0xfc3   :  { %2570 = vmatmul.mubr.msk.bf16.vlgmr.msra.gmra.mxu1 %vm451_vm6, %v2054_v63  ;;  %2576 = vmatmul.mubr.msk.bf16.vlgmr.msra.gmra.mxu0 %vm230_vm3, %v2011_v4 }
 0xfc4   :  { %v2008_v5 = vpop.f32.mrf.mxu1  ;;  %v2051_v3 = vpop.f32.mrf.mxu0 }
 0xfc6   :  { %v2558_v6 = vpop.f32.mrf.mxu1  ;;  %v2566_v9 = vpop.f32.mrf.mxu0 }
0x1083   :  { %v2092_v11 = vpop.f32.mrf.mxu1  ;;  %v2144_v14 = vpop.f32.mrf.mxu0 }
0x1084   :  { %v2145_v41 = vadd.f32 %v2144_v14, %v2092_v11 }
0x1085   :  { %v2571_v55 = vpop.f32.mrf.mxu1  ;;  %v2577_v62 = vpop.f32.mrf.mxu0 }
0x1086   :  { %2150 = vst.msk [vmem:[#allocation2 + $0x8] sm:$0xff] %vm75_vm0, %v2145_v41 }
0x1087   :  { %v2095_v50 = vpop.f32.mrf.mxu1  ;;  %v2147_v7 = vpop.f32.mrf.mxu0 }
0x1088   :  { %2720 = shalt.err (!%p2717_p4)
}
0x1089   :  { %s2735_s17 = smov 128   ;;  %s2736_s6 = smov 8   ;;  %v2572_v19 = vpop.f32.mrf.mxu1  ;;  %v2578_v2 = vpop.f32.mrf.mxu0 }
0x108a   :  { %2164 = dma.vmem_to_hbm [thread:$0]  %s2159_s16, 256, %s3385_s15, [#allocation3], %s2735_s17, %s2735_s17, %s2736_s6  }
0x108b   :  { %2729 = dma.done.wait [#allocation3], 256  }
0x108c   :  { %2730 = vsyncadd [#allocation3], 4294967040 }
0x108d   :  { %2170 = vsyncpa [#allocation3], 1 }

</bundles_post_ra>
